<compile_context>
chip_gen: v7x
topology: tpu7x:2x2x1
jax: 0.10.0
libtpu: 0.0.40
codegen_flags: <defaults>
</compile_context>

<pallas_src>
import jax
import jax.numpy as jnp
from jax.experimental import pallas as pl
from jax.experimental.pallas import tpu as pltpu

EPS = 1e-5

IN_F = 100
IN_F_PAD = 128       # lane-padded input feature dim (multiple of 128)
F1, F2, F3 = 256, 512, 512
OUT_F = 784
OUT_F_PAD = 896      # 7 * 128, lane-padded output feature dim

# Coalesced small-parameter slab layout (all offsets / lengths are multiples
# of 128, so every in-kernel slice is lane-aligned).
SLAB_W = 3456        # 27 * 128
OFF_G1, OFF_BE1 = 0, 256
OFF_G2, OFF_BE2 = 512, 1024
OFF_G3, OFF_BE3 = 1536, 2048
OFF_B4 = 2560        # b4 occupies [2560, 3456)


def _bn_relu(h, gamma, beta):
    """Training-mode BatchNorm1d (biased batch var) + ReLU, fused scale/shift."""
    inv_b = 1.0 / h.shape[0]
    mean = jnp.sum(h, axis=0, keepdims=True) * inv_b
    mean_sq = jnp.sum(h * h, axis=0, keepdims=True) * inv_b
    var = jnp.maximum(mean_sq - mean * mean, 0.0)      # clamp f32 cancellation
    scale = gamma * jax.lax.rsqrt(var + EPS)
    shift = beta - mean * scale
    return jnp.maximum(h * scale + shift, 0.0)


def generator_kernel(x_ref, w1_ref, w2_ref, w3_ref, w4_ref, p_ref, o_ref):
    # One coalesced f32 slab holds gamma/beta for the three BN layers and b4.
    g1 = p_ref[:, OFF_G1:OFF_G1 + F1]
    be1 = p_ref[:, OFF_BE1:OFF_BE1 + F1]
    g2 = p_ref[:, OFF_G2:OFF_G2 + F2]
    be2 = p_ref[:, OFF_BE2:OFF_BE2 + F2]
    g3 = p_ref[:, OFF_G3:OFF_G3 + F3]
    be3 = p_ref[:, OFF_BE3:OFF_BE3 + F3]
    b4 = p_ref[:, OFF_B4:OFF_B4 + OUT_F_PAD]

    # Layer 1: Linear(100->256) (K zero-padded to 128) + BN + ReLU.
    # b1 is omitted: any bias before training-mode BN cancels in the mean sub.
    # bf16 x bf16 MXU matmul, f32 accumulation; all elementwise math in f32.
    h = jnp.dot(x_ref[...], w1_ref[...], preferred_element_type=jnp.float32)
    h = _bn_relu(h, g1, be1)

    # Layer 2: Linear(256->512) + BN + ReLU
    h = jnp.dot(h.astype(jnp.bfloat16), w2_ref[...],
                preferred_element_type=jnp.float32)
    h = _bn_relu(h, g2, be2)

    # Layer 3: Linear(512->512) + BN + ReLU
    h = jnp.dot(h.astype(jnp.bfloat16), w3_ref[...],
                preferred_element_type=jnp.float32)
    h = _bn_relu(h, g3, be3)

    # Layer 4: Linear(512->784, padded to 896) + Tanh (lane-dense store)
    h = jnp.dot(h.astype(jnp.bfloat16), w4_ref[...],
                preferred_element_type=jnp.float32) + b4
    o_ref[...] = jnp.tanh(h)


def _vmem_spec():
    # Whole operand resident in VMEM; no grid => no double-buffering.
    return pl.BlockSpec(memory_space=pltpu.MemorySpace.VMEM)


@jax.jit
def generator_forward(x, kernel_params):
    B = x.shape[0]
    # Lane-pad the input features 100 -> 128; store bf16 (matmul LHS dtype).
    x_pad = jnp.zeros((B, IN_F_PAD), jnp.bfloat16).at[:, :IN_F].set(
        x.astype(jnp.bfloat16))

    operands = [x_pad] + list(kernel_params)
    out_pad = pl.pallas_call(
        generator_kernel,
        out_shape=jax.ShapeDtypeStruct((B, OUT_F_PAD), jnp.float32),
        in_specs=[_vmem_spec() for _ in operands],
        out_specs=_vmem_spec(),
        compiler_params=pltpu.CompilerParams(
            vmem_limit_bytes=16 << 20,
        ),
    )(*operands)
    return out_pad[:, :OUT_F]


def init_params(key):
    """PyTorch-equivalent f32 parameters.  Linear weights stored (in, out)."""
    dims = [(IN_F, F1), (F1, F2), (F2, F3), (F3, OUT_F)]
    params = []
    for idx, (fan_in, fan_out) in enumerate(dims):
        kw, kb, kg, kbeta = jax.random.split(jax.random.fold_in(key, idx), 4)
        bound = 1.0 / jnp.sqrt(fan_in)
        w = jax.random.uniform(kw, (fan_in, fan_out), jnp.float32, -bound, bound)
        b = jax.random.uniform(kb, (1, fan_out), jnp.float32, -bound, bound)
        params += [w, b]
        if idx < 3:  # BatchNorm1d after the first three Linears
            gamma = 1.0 + 0.1 * jax.random.normal(kg, (1, fan_out), jnp.float32)
            beta = 0.1 * jax.random.normal(kbeta, (1, fan_out), jnp.float32)
            params += [gamma, beta]
    return params


def pack_kernel_params(params):
    """Kernel-side layout:
       * weights cast to bf16 (native single-pass MXU path, half the DMA),
       * w1 zero-padded 100->128 on the contraction dim,
       * w4 zero-padded 784->896 output features,
       * b1..b3 dropped (exactly cancelled by the BN mean subtraction),
       * gamma/beta x3 and b4 coalesced into one lane-aligned f32 slab."""
    (w1, b1, g1, be1, w2, b2, g2, be2, w3, b3, g3, be3, w4, b4) = params

    w1p = jnp.zeros((IN_F_PAD, F1), jnp.float32).at[:IN_F, :].set(w1)
    w4p = jnp.zeros((F3, OUT_F_PAD), jnp.float32).at[:, :OUT_F].set(w4)

    slab = jnp.zeros((1, SLAB_W), jnp.float32)
    slab = slab.at[:, OFF_G1:OFF_G1 + F1].set(g1)
    slab = slab.at[:, OFF_BE1:OFF_BE1 + F1].set(be1)
    slab = slab.at[:, OFF_G2:OFF_G2 + F2].set(g2)
    slab = slab.at[:, OFF_BE2:OFF_BE2 + F2].set(be2)
    slab = slab.at[:, OFF_G3:OFF_G3 + F3].set(g3)
    slab = slab.at[:, OFF_BE3:OFF_BE3 + F3].set(be3)
    slab = slab.at[:, OFF_B4:OFF_B4 + OUT_F].set(b4)

    return [
        w1p.astype(jnp.bfloat16),
        w2.astype(jnp.bfloat16),
        w3.astype(jnp.bfloat16),
        w4p.astype(jnp.bfloat16),
        slab,
    ]


def reference_forward(x, params):
    """Pure-JAX f32 reference matching the PyTorch module (training-mode BN)."""
    (w1, b1, g1, be1, w2, b2, g2, be2, w3, b3, g3, be3, w4, b4) = params

    def bn_relu(h, g, be):
        m = jnp.mean(h, axis=0, keepdims=True)
        v = jnp.mean((h - m) ** 2, axis=0, keepdims=True)
        return jnp.maximum((h - m) / jnp.sqrt(v + EPS) * g + be, 0.0)

    h = bn_relu(x @ w1 + b1, g1, be1)
    h = bn_relu(h @ w2 + b2, g2, be2)
    h = bn_relu(h @ w3 + b3, g3, be3)
    return jnp.tanh(h @ w4 + b4)


def bf16_math_reference(x, params):
    """Pure-JAX reference replicating the kernel's numerics exactly:
       bf16 x bf16 dots with f32 accumulation, f32 fused BN, b1..b3 elided."""
    (w1, b1, g1, be1, w2, b2, g2, be2, w3, b3, g3, be3, w4, b4) = params

    def dot16(a, w):
        return jnp.dot(a.astype(jnp.bfloat16), w.astype(jnp.bfloat16),
                       preferred_element_type=jnp.float32)

    def bn_relu(h, g, be):
        inv_b = 1.0 / h.shape[0]
        m = jnp.sum(h, axis=0, keepdims=True) * inv_b
        msq = jnp.sum(h * h, axis=0, keepdims=True) * inv_b
        v = jnp.maximum(msq - m * m, 0.0)
        scale = g * jax.lax.rsqrt(v + EPS)
        shift = be - m * scale
        return jnp.maximum(h * scale + shift, 0.0)

    h = bn_relu(dot16(x, w1), g1, be1)
    h = bn_relu(dot16(h, w2), g2, be2)
    h = bn_relu(dot16(h, w3), g3, be3)
    return jnp.tanh(dot16(h, w4) + b4)


if __name__ == "__main__":
    key = jax.random.PRNGKey(0)
    k_x, k_p = jax.random.split(key)

    B = 8  # >=2 required for training-mode BatchNorm semantics
    x = jax.random.normal(k_x, (B, IN_F), jnp.float32)
    params = init_params(k_p)
    kernel_params = pack_kernel_params(params)

    out = jax.block_until_ready(generator_forward(x, kernel_params))
    assert out.shape == (B, OUT_F), out.shape

    # Implementation check: reference with the exact same numerics (bf16 dots,
    # f32 BN) -- isolates kernel correctness from quantization effects.
    ref_q = bf16_math_reference(x, params)
    err_q = float(jnp.max(jnp.abs(out - ref_q)))
    assert jnp.allclose(out, ref_q, atol=2e-2, rtol=0.0), err_q

    # Semantics check against the full-precision PyTorch-equivalent module
    # (tolerance loosened to cover bf16 weight + activation quantization).
    ref = reference_forward(x, params)
    err = float(jnp.max(jnp.abs(out - ref)))
    assert jnp.allclose(out, ref, atol=1.5e-1, rtol=0.0), err

    print("KERNEL_OK")
</pallas_src>

<mosaic_0001>
module attributes {stable_mosaic.version = 11 : i64} {
  func.func @generator_kernel(%arg0: memref<8x128xbf16, #tpu.memory_space<vmem>>, %arg1: memref<128x256xbf16, #tpu.memory_space<vmem>>, %arg2: memref<256x512xbf16, #tpu.memory_space<vmem>>, %arg3: memref<512x512xbf16, #tpu.memory_space<vmem>>, %arg4: memref<512x896xbf16, #tpu.memory_space<vmem>>, %arg5: memref<1x3456xf32, #tpu.memory_space<vmem>>, %arg6: memref<8x896xf32, #tpu.memory_space<vmem>>) attributes {dimension_semantics = [], scalar_prefetch = 0 : i64, scratch_operands = 0 : i64, tpu.core_type = #tpu.core_type<tc>} {
    %c0 = arith.constant 0 : index
    %c0_0 = arith.constant 0 : index
    %0 = vector.load %arg5[%c0, %c0_0] : memref<1x3456xf32, #tpu.memory_space<vmem>>, vector<1x256xf32>
    %c0_1 = arith.constant 0 : index
    %c256 = arith.constant 256 : index
    %1 = vector.load %arg5[%c0_1, %c256] : memref<1x3456xf32, #tpu.memory_space<vmem>>, vector<1x256xf32>
    %c0_2 = arith.constant 0 : index
    %c512 = arith.constant 512 : index
    %2 = vector.load %arg5[%c0_2, %c512] : memref<1x3456xf32, #tpu.memory_space<vmem>>, vector<1x512xf32>
    %c0_3 = arith.constant 0 : index
    %c1024 = arith.constant 1024 : index
    %3 = vector.load %arg5[%c0_3, %c1024] : memref<1x3456xf32, #tpu.memory_space<vmem>>, vector<1x512xf32>
    %c0_4 = arith.constant 0 : index
    %c1536 = arith.constant 1536 : index
    %4 = vector.load %arg5[%c0_4, %c1536] : memref<1x3456xf32, #tpu.memory_space<vmem>>, vector<1x512xf32>
    %c0_5 = arith.constant 0 : index
    %c2048 = arith.constant 2048 : index
    %5 = vector.load %arg5[%c0_5, %c2048] : memref<1x3456xf32, #tpu.memory_space<vmem>>, vector<1x512xf32>
    %c0_6 = arith.constant 0 : index
    %c2560 = arith.constant 2560 : index
    %6 = vector.load %arg5[%c0_6, %c2560] : memref<1x3456xf32, #tpu.memory_space<vmem>>, vector<1x896xf32>
    %c0_7 = arith.constant 0 : index
    %c0_8 = arith.constant 0 : index
    %7 = vector.load %arg0[%c0_7, %c0_8] : memref<8x128xbf16, #tpu.memory_space<vmem>>, vector<8x128xbf16>
    %c0_9 = arith.constant 0 : index
    %c0_10 = arith.constant 0 : index
    %8 = vector.load %arg1[%c0_9, %c0_10] : memref<128x256xbf16, #tpu.memory_space<vmem>>, vector<128x256xbf16>
    %cst = arith.constant dense<0.000000e+00> : vector<8x256xf32>
    %9 = tpu.matmul %7, %8, %cst {dimension_numbers = #tpu.dot_dimension_numbers<[1], [0], [0], [1], [0, 0, 1, 1], [], []>} : vector<8x128xbf16>, vector<128x256xbf16>, vector<8x256xf32> -> vector<8x256xf32>
    %cst_11 = arith.constant dense<0.000000e+00> : vector<256xf32>
    %10 = vector.multi_reduction <add>, %9, %cst_11 [0] : vector<8x256xf32> to vector<256xf32>
    %11 = vector.shape_cast %10 : vector<256xf32> to vector<1x256xf32>
    %cst_12 = arith.constant 1.250000e-01 : f32
    %12 = vector.broadcast %cst_12 : f32 to vector<1x256xf32>
    %13 = arith.mulf %11, %12 : vector<1x256xf32>
    %14 = arith.mulf %9, %9 : vector<8x256xf32>
    %cst_13 = arith.constant dense<0.000000e+00> : vector<256xf32>
    %15 = vector.multi_reduction <add>, %14, %cst_13 [0] : vector<8x256xf32> to vector<256xf32>
    %16 = vector.shape_cast %15 : vector<256xf32> to vector<1x256xf32>
    %cst_14 = arith.constant 1.250000e-01 : f32
    %17 = vector.broadcast %cst_14 : f32 to vector<1x256xf32>
    %18 = arith.mulf %16, %17 : vector<1x256xf32>
    %19 = arith.mulf %13, %13 : vector<1x256xf32>
    %20 = arith.subf %18, %19 : vector<1x256xf32>
    %cst_15 = arith.constant 0.000000e+00 : f32
    %21 = vector.broadcast %cst_15 : f32 to vector<1x256xf32>
    %22 = arith.maximumf %20, %21 : vector<1x256xf32>
    %cst_16 = arith.constant 9.99999974E-6 : f32
    %23 = vector.broadcast %cst_16 : f32 to vector<1x256xf32>
    %24 = arith.addf %22, %23 : vector<1x256xf32>
    %25 = math.rsqrt %24 : vector<1x256xf32>
    %26 = arith.mulf %0, %25 : vector<1x256xf32>
    %27 = arith.mulf %13, %26 : vector<1x256xf32>
    %28 = arith.subf %1, %27 : vector<1x256xf32>
    %29 = vector.broadcast %26 : vector<1x256xf32> to vector<8x256xf32>
    %30 = arith.mulf %9, %29 : vector<8x256xf32>
    %31 = vector.broadcast %28 : vector<1x256xf32> to vector<8x256xf32>
    %32 = arith.addf %30, %31 : vector<8x256xf32>
    %cst_17 = arith.constant 0.000000e+00 : f32
    %33 = vector.broadcast %cst_17 : f32 to vector<8x256xf32>
    %34 = arith.maximumf %32, %33 : vector<8x256xf32>
    %35 = arith.truncf %34 : vector<8x256xf32> to vector<8x256xbf16>
    %c0_18 = arith.constant 0 : index
    %c0_19 = arith.constant 0 : index
    %36 = vector.load %arg2[%c0_18, %c0_19] : memref<256x512xbf16, #tpu.memory_space<vmem>>, vector<256x512xbf16>
    %cst_20 = arith.constant dense<0.000000e+00> : vector<8x512xf32>
    %37 = tpu.matmul %35, %36, %cst_20 {dimension_numbers = #tpu.dot_dimension_numbers<[1], [0], [0], [1], [0, 0, 1, 1], [], []>} : vector<8x256xbf16>, vector<256x512xbf16>, vector<8x512xf32> -> vector<8x512xf32>
    %cst_21 = arith.constant dense<0.000000e+00> : vector<512xf32>
    %38 = vector.multi_reduction <add>, %37, %cst_21 [0] : vector<8x512xf32> to vector<512xf32>
    %39 = vector.shape_cast %38 : vector<512xf32> to vector<1x512xf32>
    %cst_22 = arith.constant 1.250000e-01 : f32
    %40 = vector.broadcast %cst_22 : f32 to vector<1x512xf32>
    %41 = arith.mulf %39, %40 : vector<1x512xf32>
    %42 = arith.mulf %37, %37 : vector<8x512xf32>
    %cst_23 = arith.constant dense<0.000000e+00> : vector<512xf32>
    %43 = vector.multi_reduction <add>, %42, %cst_23 [0] : vector<8x512xf32> to vector<512xf32>
    %44 = vector.shape_cast %43 : vector<512xf32> to vector<1x512xf32>
    %cst_24 = arith.constant 1.250000e-01 : f32
    %45 = vector.broadcast %cst_24 : f32 to vector<1x512xf32>
    %46 = arith.mulf %44, %45 : vector<1x512xf32>
    %47 = arith.mulf %41, %41 : vector<1x512xf32>
    %48 = arith.subf %46, %47 : vector<1x512xf32>
    %cst_25 = arith.constant 0.000000e+00 : f32
    %49 = vector.broadcast %cst_25 : f32 to vector<1x512xf32>
    %50 = arith.maximumf %48, %49 : vector<1x512xf32>
    %cst_26 = arith.constant 9.99999974E-6 : f32
    %51 = vector.broadcast %cst_26 : f32 to vector<1x512xf32>
    %52 = arith.addf %50, %51 : vector<1x512xf32>
    %53 = math.rsqrt %52 : vector<1x512xf32>
    %54 = arith.mulf %2, %53 : vector<1x512xf32>
    %55 = arith.mulf %41, %54 : vector<1x512xf32>
    %56 = arith.subf %3, %55 : vector<1x512xf32>
    %57 = vector.broadcast %54 : vector<1x512xf32> to vector<8x512xf32>
    %58 = arith.mulf %37, %57 : vector<8x512xf32>
    %59 = vector.broadcast %56 : vector<1x512xf32> to vector<8x512xf32>
    %60 = arith.addf %58, %59 : vector<8x512xf32>
    %cst_27 = arith.constant 0.000000e+00 : f32
    %61 = vector.broadcast %cst_27 : f32 to vector<8x512xf32>
    %62 = arith.maximumf %60, %61 : vector<8x512xf32>
    %63 = arith.truncf %62 : vector<8x512xf32> to vector<8x512xbf16>
    %c0_28 = arith.constant 0 : index
    %c0_29 = arith.constant 0 : index
    %64 = vector.load %arg3[%c0_28, %c0_29] : memref<512x512xbf16, #tpu.memory_space<vmem>>, vector<512x512xbf16>
    %cst_30 = arith.constant dense<0.000000e+00> : vector<8x512xf32>
    %65 = tpu.matmul %63, %64, %cst_30 {dimension_numbers = #tpu.dot_dimension_numbers<[1], [0], [0], [1], [0, 0, 1, 1], [], []>} : vector<8x512xbf16>, vector<512x512xbf16>, vector<8x512xf32> -> vector<8x512xf32>
    %cst_31 = arith.constant dense<0.000000e+00> : vector<512xf32>
    %66 = vector.multi_reduction <add>, %65, %cst_31 [0] : vector<8x512xf32> to vector<512xf32>
    %67 = vector.shape_cast %66 : vector<512xf32> to vector<1x512xf32>
    %cst_32 = arith.constant 1.250000e-01 : f32
    %68 = vector.broadcast %cst_32 : f32 to vector<1x512xf32>
    %69 = arith.mulf %67, %68 : vector<1x512xf32>
    %70 = arith.mulf %65, %65 : vector<8x512xf32>
    %cst_33 = arith.constant dense<0.000000e+00> : vector<512xf32>
    %71 = vector.multi_reduction <add>, %70, %cst_33 [0] : vector<8x512xf32> to vector<512xf32>
    %72 = vector.shape_cast %71 : vector<512xf32> to vector<1x512xf32>
    %cst_34 = arith.constant 1.250000e-01 : f32
    %73 = vector.broadcast %cst_34 : f32 to vector<1x512xf32>
    %74 = arith.mulf %72, %73 : vector<1x512xf32>
    %75 = arith.mulf %69, %69 : vector<1x512xf32>
    %76 = arith.subf %74, %75 : vector<1x512xf32>
    %cst_35 = arith.constant 0.000000e+00 : f32
    %77 = vector.broadcast %cst_35 : f32 to vector<1x512xf32>
    %78 = arith.maximumf %76, %77 : vector<1x512xf32>
    %cst_36 = arith.constant 9.99999974E-6 : f32
    %79 = vector.broadcast %cst_36 : f32 to vector<1x512xf32>
    %80 = arith.addf %78, %79 : vector<1x512xf32>
    %81 = math.rsqrt %80 : vector<1x512xf32>
    %82 = arith.mulf %4, %81 : vector<1x512xf32>
    %83 = arith.mulf %69, %82 : vector<1x512xf32>
    %84 = arith.subf %5, %83 : vector<1x512xf32>
    %85 = vector.broadcast %82 : vector<1x512xf32> to vector<8x512xf32>
    %86 = arith.mulf %65, %85 : vector<8x512xf32>
    %87 = vector.broadcast %84 : vector<1x512xf32> to vector<8x512xf32>
    %88 = arith.addf %86, %87 : vector<8x512xf32>
    %cst_37 = arith.constant 0.000000e+00 : f32
    %89 = vector.broadcast %cst_37 : f32 to vector<8x512xf32>
    %90 = arith.maximumf %88, %89 : vector<8x512xf32>
    %91 = arith.truncf %90 : vector<8x512xf32> to vector<8x512xbf16>
    %c0_38 = arith.constant 0 : index
    %c0_39 = arith.constant 0 : index
    %92 = vector.load %arg4[%c0_38, %c0_39] : memref<512x896xbf16, #tpu.memory_space<vmem>>, vector<512x896xbf16>
    %cst_40 = arith.constant dense<0.000000e+00> : vector<8x896xf32>
    %93 = tpu.matmul %91, %92, %cst_40 {dimension_numbers = #tpu.dot_dimension_numbers<[1], [0], [0], [1], [0, 0, 1, 1], [], []>} : vector<8x512xbf16>, vector<512x896xbf16>, vector<8x896xf32> -> vector<8x896xf32>
    %94 = vector.broadcast %6 : vector<1x896xf32> to vector<8x896xf32>
    %95 = arith.addf %93, %94 : vector<8x896xf32>
    %96 = math.tanh %95 : vector<8x896xf32>
    %c0_41 = arith.constant 0 : index
    %c0_42 = arith.constant 0 : index
    %97 = vector.load %arg6[%c0_41, %c0_42] : memref<8x896xf32, #tpu.memory_space<vmem>>, vector<8x896xf32>
    tpu.vector_store %arg6[%c0_41, %c0_42], %96 {strides = array<i32>} : memref<8x896xf32, #tpu.memory_space<vmem>>, vector<8x896xf32>,
    return
  }
}

</mosaic_0001>

<bundles_post_ra>
// kernel: generator_forward.1
= control target key start
LH: loop header
LB: loop body
LE: loop exit
PB: predicated region body
PF: predicated region fallthrough
CT: control target
= control target key end

     0   :  { %11 = vsyncpa [#allocation3], 0  ;;  %s5535_s0 = inlined_call_operand.vmem [shape: bf16[8,128], index: 0, kind: input, shape index: {}]   ;;  %s5536_s1 = inlined_call_operand.hbm [shape: bf16[128,256], index: 1, kind: input, shape index: {}]   ;;  %s5537_s2 = inlined_call_operand.hbm [shape: bf16[256,512], index: 2, kind: input, shape index: {}]   ;;  %s5538_s3 = inlined_call_operand.hbm [shape: bf16[512,512], index: 3, kind: input, shape index: {}]   ;;  %s5539_s4 = inlined_call_operand.hbm [shape: bf16[512,896], index: 4, kind: input, shape index: {}]   ;;  %s5540_s5 = inlined_call_operand.vmem [shape: f32[1,3456], index: 5, kind: input, shape index: {}]   ;;  %s5541_s6 = inlined_call_operand.hbm [shape: f32[8,896], index: 6, kind: output, shape index: {}]  }
   0x1   :  { %12 = vsyncpa [#allocation6], 0 }
   0x2   :  { %13 = vsyncpa [#allocation9], 0 }
   0x3   :  { %14 = vsyncpa [#allocation4], 0  ;;  %s5237_s21 = smov [#allocation5]   ;;  %s5119_s25 = scalar_lea.hbm %s5537_s2, 8192 }
   0x4   :  { %s34_s22 = sshll.u32 %s5237_s21, 4  ;;  %p5120_p0 = scmp.ne.s32.totalorder %s5537_s2, %s5119_s25  ;;  %s35_s22 = int_to_ptr.vmem [resolvable:$true] %s34_s22 }
   0x5   :  { %p5123_p1 = scmp.lt.u32.totalorder %s5119_s25, %s5537_s2 }
   0x7   :  { %p5125_p2 = pnand %p5123_p1, %p5120_p0 }
   0x9   :  { %5128 = shalt.err (!%p5125_p2)
}
   0xa   :  { %s5129_s30 = scalar_lea.vmem %s35_s22, 8192  ;;  %p5134_p4 = scmp.lt.s32.totalorder %s35_s22, %s35_s22 }
   0xb   :  { %p5130_p3 = scmp.ne.s32.totalorder %s35_s22, %s5129_s30  ;;  %p5135_p5 = scmp.lt.s32.totalorder %s5129_s30, %s5129_s30 }
   0xd   :  { %p5136_p6 = por %p5135_p5, %p5134_p4 }
   0xf   :  { %p5137_p7 = pnand %p5136_p6, %p5130_p3 }
  0x11   :  { %5140 = shalt.err (!%p5137_p7)
}
  0x12   :  { %s5238_s7 = smov 256   ;;  %s5239_s8 = smov 16  }
  0x13   :  { %40 = dma.hbm_to_vmem [thread:$0]  %s5537_s2, 8192, %s35_s22, [#allocation6], %s5238_s7, %s5238_s7, %s5239_s8  }
  0x14   :  { %s5240_s11 = smov [#allocation2]   ;;  %s5141_s15 = scalar_lea.hbm %s5536_s1, 2048 }
  0x15   :  { %s22_s12 = sshll.u32 %s5240_s11, 4  ;;  %p5142_p8 = scmp.ne.s32.totalorder %s5536_s1, %s5141_s15  ;;  %s23_s12 = int_to_ptr.vmem [resolvable:$true] %s22_s12 }
  0x16   :  { %p5145_p9 = scmp.lt.u32.totalorder %s5141_s15, %s5536_s1 }
  0x18   :  { %p5147_p10 = pnand %p5145_p9, %p5142_p8 }
  0x1a   :  { %5150 = shalt.err (!%p5147_p10)
}
  0x1b   :  { %s5151_s20 = scalar_lea.vmem %s23_s12, 2048  ;;  %p5156_p12 = scmp.lt.s32.totalorder %s23_s12, %s23_s12 }
  0x1c   :  { %p5152_p11 = scmp.ne.s32.totalorder %s23_s12, %s5151_s20  ;;  %p5157_p13 = scmp.lt.s32.totalorder %s5151_s20, %s5151_s20 }
  0x1e   :  { %p5158_p0 = por %p5157_p13, %p5156_p12 }
  0x20   :  { %p5159_p1 = pnand %p5158_p0, %p5152_p11 }
  0x22   :  { %5162 = shalt.err (!%p5159_p1)
}
  0x23   :  { %s5241_s2 = smov 128   ;;  %s5242_s21 = smov 8  }
  0x24   :  { %28 = dma.hbm_to_vmem [thread:$0]  %s5536_s1, 2048, %s23_s12, [#allocation3], %s5241_s2, %s5241_s2, %s5242_s21  }
  0x25   :  { %s5243_s24 = smov [#allocation7]   ;;  %s5244_s26 = smov [#allocation8]  }
  0x26   :  { %s46_s25 = sshll.u32 %s5243_s24, 4  ;;  %s58_s27 = sshll.u32 %s5244_s26, 4  ;;  %s47_s25 = int_to_ptr.vmem [resolvable:$true] %s46_s25  ;;  %s5312_s27 = int_to_ptr.vmem [resolvable:$true] %s58_s27 }
  0x27   :  { %s5163_s30 = scalar_lea.hbm %s5538_s3, 16384 }
  0x28   :  { %p5164_p2 = scmp.ne.s32.totalorder %s5538_s3, %s5163_s30  ;;  %p5167_p3 = scmp.lt.u32.totalorder %s5163_s30, %s5538_s3 }
  0x2a   :  { %p5169_p4 = pnand %p5167_p3, %p5164_p2 }
  0x2c   :  { %5172 = shalt.err (!%p5169_p4)
}
  0x2d   :  { %s5173_s1 = scalar_lea.vmem %s47_s25, 16384  ;;  %p5178_p6 = scmp.lt.s32.totalorder %s47_s25, %s47_s25 }
  0x2e   :  { %p5174_p5 = scmp.ne.s32.totalorder %s47_s25, %s5173_s1  ;;  %p5179_p7 = scmp.lt.s32.totalorder %s5173_s1, %s5173_s1 }
  0x30   :  { %p5180_p8 = por %p5179_p7, %p5178_p6 }
  0x32   :  { %p5181_p9 = pnand %p5180_p8, %p5174_p5 }
  0x34   :  { %5184 = shalt.err (!%p5181_p9)
}
  0x35   :  { %52 = dma.hbm_to_vmem [thread:$0]  %s5538_s3, 16384, %s47_s25, [#allocation6], %s5238_s7, %s5238_s7, %s5239_s8  }
  0x36   :  { %s5185_s17 = scalar_lea.hbm %s5539_s4, 28672 }
  0x37   :  { %p5186_p10 = scmp.ne.s32.totalorder %s5539_s4, %s5185_s17  ;;  %p5189_p11 = scmp.lt.u32.totalorder %s5185_s17, %s5539_s4 }
  0x39   :  { %p5191_p12 = pnand %p5189_p11, %p5186_p10 }
  0x3b   :  { %5194 = shalt.err (!%p5191_p12)
}
  0x3c   :  { %s5195_s21 = scalar_lea.vmem %s5312_s27, 28672  ;;  %p5200_p0 = scmp.lt.s32.totalorder %s5312_s27, %s5312_s27 }
  0x3d   :  { %p5196_p13 = scmp.ne.s32.totalorder %s5312_s27, %s5195_s21  ;;  %p5201_p1 = scmp.lt.s32.totalorder %s5195_s21, %s5195_s21 }
  0x3f   :  { %p5202_p2 = por %p5201_p1, %p5200_p0 }
  0x41   :  { %p5203_p3 = pnand %p5202_p2, %p5196_p13 }
  0x43   :  { %5206 = shalt.err (!%p5203_p3)
}
  0x44   :  { %s5245_s3 = smov 448   ;;  %s5246_s7 = smov 28  }
  0x45   :  { %64 = dma.hbm_to_vmem [thread:$0]  %s5539_s4, 28672, %s5312_s27, [#allocation9], %s5245_s3, %s5245_s3, %s5246_s7  }
  0x46   :  { %5229 = dma.done.wait [#allocation3], 2048  }
  0x47   :  { %5230 = vsyncadd [#allocation3], 4294965248 }
  0x48   :  { %5231 = dma.done.wait [#allocation6], 24576  }
  0x49   :  { %5232 = vsyncadd [#allocation6], 4294942720 }
  0x4a   :  { %5233 = dma.done.wait [#allocation9], 28672  }
  0x4b   :  { %5234 = vsyncadd [#allocation9], 4294938624  ;;  %v5247_v0 = vmov 0   ;;  %v4453_v1 = vld [vmem:[#allocation2 + $0x4] ss:$8 sps:$4 sm:$0xff]  }
  0x4c   :  { %216 = vmatprep.mubr.bf16.mxu0 %v5247_v0  ;;  %v4455_v2 = vld [vmem:[#allocation2] ss:$8 sps:$4 sm:$0xff]   ;;  %184 = vmatprep.subr.bf16.mxu0 %v4453_v1  ;;  %v4456_v3 = vld [vmem:[#allocation2 + $0x14] ss:$8 sps:$4 sm:$0xff]   ;;  %v4458_v4 = vld [vmem:[#allocation2 + $0x10] ss:$8 sps:$4 sm:$0xff]  }
  0x4d   :  { %185 = vmatpush1.bf16.msra.mxu0 %v4455_v2  ;;  %v4459_v5 = vld [vmem:[#allocation2 + $0x24] ss:$8 sps:$4 sm:$0xff]   ;;  %v4461_v6 = vld [vmem:[#allocation2 + $0x20] ss:$8 sps:$4 sm:$0xff]   ;;  %v4462_v7 = vld [vmem:[#allocation2 + $0x34] ss:$8 sps:$4 sm:$0xff]  }
  0x4e   :  { %186 = vmatprep.subr.bf16.mxu0 %v4456_v3  ;;  %v4464_v8 = vld [vmem:[#allocation2 + $0x30] ss:$8 sps:$4 sm:$0xff]   ;;  %v4465_v9 = vld [vmem:[#allocation2 + $0x44] ss:$8 sps:$4 sm:$0xff]   ;;  %v4467_v10 = vld [vmem:[#allocation2 + $0x40] ss:$8 sps:$4 sm:$0xff]  }
  0x4f   :  { %v4468_v11 = vld [vmem:[#allocation2 + $0x54] ss:$8 sps:$4 sm:$0xff]   ;;  %v4470_v12 = vld [vmem:[#allocation2 + $0x50] ss:$8 sps:$4 sm:$0xff]   ;;  %v4471_v13 = vld [vmem:[#allocation2 + $0x64] ss:$8 sps:$4 sm:$0xff]  }
  0x50   :  { %v4473_v14 = vld [vmem:[#allocation2 + $0x60] ss:$8 sps:$4 sm:$0xff]   ;;  %v4474_v15 = vld [vmem:[#allocation2 + $0x74] ss:$8 sps:$4 sm:$0xff]   ;;  %v4476_v16 = vld [vmem:[#allocation2 + $0x70] ss:$8 sps:$4 sm:$0xff]  }
  0x51   :  { %187 = vmatpush1.bf16.msra.mxu0 %v4458_v4  ;;  %v87_v17 = vld [vmem:[%s5535_s0] sm:$0xf]  ;;  %v4477_v18 = vld [vmem:[#allocation5 + $0x4] ss:$16 sps:$4 sm:$0xff]   ;;  %v4481_v19 = vld [vmem:[#allocation5 + $0xc] ss:$16 sps:$4 sm:$0xff]  }
  0x52   :  { %188 = vmatprep.subr.bf16.mxu0 %v4459_v5  ;;  %v4479_v20 = vld [vmem:[#allocation5 + $0x8] ss:$16 sps:$4 sm:$0xff]   ;;  %v4482_v21 = vld [vmem:[#allocation5] ss:$16 sps:$4 sm:$0xff]   ;;  %719 = vmatprep.subr.bf16.mxu1 %v4477_v18  ;;  %v4483_v22 = vld [vmem:[#allocation5 + $0x24] ss:$16 sps:$4 sm:$0xff]  }
  0x53   :  { %720 = vmatpush1.bf16.msra.mxu1 %v4482_v21  ;;  %v4487_v23 = vld [vmem:[#allocation5 + $0x2c] ss:$16 sps:$4 sm:$0xff]   ;;  %v4485_v24 = vld [vmem:[#allocation5 + $0x28] ss:$16 sps:$4 sm:$0xff]   ;;  %v4488_v25 = vld [vmem:[#allocation5 + $0x20] ss:$16 sps:$4 sm:$0xff]  }
  0x54   :  { %721 = vmatprep.subr.bf16.mxu1 %v4483_v22  ;;  %v4489_v26 = vld [vmem:[#allocation5 + $0x44] ss:$16 sps:$4 sm:$0xff]   ;;  %v4493_v27 = vld [vmem:[#allocation5 + $0x4c] ss:$16 sps:$4 sm:$0xff]   ;;  %v4491_v28 = vld [vmem:[#allocation5 + $0x48] ss:$16 sps:$4 sm:$0xff]  }
  0x55   :  { %189 = vmatpush1.bf16.msra.mxu0 %v4461_v6  ;;  %v4494_v29 = vld [vmem:[#allocation5 + $0x40] ss:$16 sps:$4 sm:$0xff]   ;;  %v4495_v30 = vld [vmem:[#allocation5 + $0x64] ss:$16 sps:$4 sm:$0xff]   ;;  %v4499_v31 = vld [vmem:[#allocation5 + $0x6c] ss:$16 sps:$4 sm:$0xff]  }
  0x56   :  { %190 = vmatprep.subr.bf16.mxu0 %v4462_v7  ;;  %v4497_v32 = vld [vmem:[#allocation5 + $0x68] ss:$16 sps:$4 sm:$0xff]   ;;  %v4500_v33 = vld [vmem:[#allocation5 + $0x60] ss:$16 sps:$4 sm:$0xff]   ;;  %v4501_v34 = vld [vmem:[#allocation5 + $0x84] ss:$16 sps:$4 sm:$0xff]  }
  0x57   :  { %722 = vmatpush1.bf16.msra.mxu1 %v4488_v25  ;;  %v4505_v35 = vld [vmem:[#allocation5 + $0x8c] ss:$16 sps:$4 sm:$0xff]   ;;  %v4503_v36 = vld [vmem:[#allocation5 + $0x88] ss:$16 sps:$4 sm:$0xff]   ;;  %v4506_v37 = vld [vmem:[#allocation5 + $0x80] ss:$16 sps:$4 sm:$0xff]  }
  0x58   :  { %723 = vmatprep.subr.bf16.mxu1 %v4489_v26  ;;  %v4507_v38 = vld [vmem:[#allocation5 + $0xa4] ss:$16 sps:$4 sm:$0xff]   ;;  %v4511_v39 = vld [vmem:[#allocation5 + $0xac] ss:$16 sps:$4 sm:$0xff]   ;;  %v4509_v40 = vld [vmem:[#allocation5 + $0xa8] ss:$16 sps:$4 sm:$0xff]  }
  0x59   :  { %191 = vmatpush1.bf16.msra.mxu0 %v4464_v8  ;;  %v4512_v41 = vld [vmem:[#allocation5 + $0xa0] ss:$16 sps:$4 sm:$0xff]   ;;  %v4513_v42 = vld [vmem:[#allocation5 + $0xc4] ss:$16 sps:$4 sm:$0xff]   ;;  %v4517_v43 = vld [vmem:[#allocation5 + $0xcc] ss:$16 sps:$4 sm:$0xff]  }
  0x5a   :  { %192 = vmatprep.subr.bf16.mxu0 %v4465_v9  ;;  %v4515_v44 = vld [vmem:[#allocation5 + $0xc8] ss:$16 sps:$4 sm:$0xff]   ;;  %v4518_v45 = vld [vmem:[#allocation5 + $0xc0] ss:$16 sps:$4 sm:$0xff]   ;;  %v4519_v46 = vld [vmem:[#allocation5 + $0xe4] ss:$16 sps:$4 sm:$0xff]  }
  0x5b   :  { %724 = vmatpush1.bf16.msra.mxu1 %v4494_v29  ;;  %v4523_v47 = vld [vmem:[#allocation5 + $0xec] ss:$16 sps:$4 sm:$0xff]   ;;  %v4521_v48 = vld [vmem:[#allocation5 + $0xe8] ss:$16 sps:$4 sm:$0xff]   ;;  %v4524_v49 = vld [vmem:[#allocation5 + $0xe0] ss:$16 sps:$4 sm:$0xff]  }
  0x5c   :  { %725 = vmatprep.subr.bf16.mxu1 %v4495_v30  ;;  %v4525_v50 = vld [vmem:[#allocation5 + $0x104] ss:$16 sps:$4 sm:$0xff]   ;;  %v4529_v51 = vld [vmem:[#allocation5 + $0x10c] ss:$16 sps:$4 sm:$0xff]   ;;  %v4527_v52 = vld [vmem:[#allocation5 + $0x108] ss:$16 sps:$4 sm:$0xff]  }
  0x5d   :  { %193 = vmatpush1.bf16.msra.mxu0 %v4467_v10  ;;  %v4530_v53 = vld [vmem:[#allocation5 + $0x100] ss:$16 sps:$4 sm:$0xff]   ;;  %v4531_v54 = vld [vmem:[#allocation5 + $0x124] ss:$16 sps:$4 sm:$0xff]   ;;  %v4535_v55 = vld [vmem:[#allocation5 + $0x12c] ss:$16 sps:$4 sm:$0xff]  }
  0x5e   :  { %194 = vmatprep.subr.bf16.mxu0 %v4468_v11  ;;  %v4533_v56 = vld [vmem:[#allocation5 + $0x128] ss:$16 sps:$4 sm:$0xff]   ;;  %v4536_v57 = vld [vmem:[#allocation5 + $0x120] ss:$16 sps:$4 sm:$0xff]   ;;  %v4537_v58 = vld [vmem:[#allocation5 + $0x144] ss:$16 sps:$4 sm:$0xff]  }
  0x5f   :  { %726 = vmatpush1.bf16.msra.mxu1 %v4500_v33  ;;  %v4541_v59 = vld [vmem:[#allocation5 + $0x14c] ss:$16 sps:$4 sm:$0xff]   ;;  %v4539_v60 = vld [vmem:[#allocation5 + $0x148] ss:$16 sps:$4 sm:$0xff]   ;;  %v4542_v61 = vld [vmem:[#allocation5 + $0x140] ss:$16 sps:$4 sm:$0xff]  }
  0x60   :  { %727 = vmatprep.subr.bf16.mxu1 %v4501_v34  ;;  %v4543_v62 = vld [vmem:[#allocation5 + $0x164] ss:$16 sps:$4 sm:$0xff]   ;;  %v4547_v63 = vld [vmem:[#allocation5 + $0x16c] ss:$16 sps:$4 sm:$0xff]   ;;  %v4545_v0 = vld [vmem:[#allocation5 + $0x168] ss:$16 sps:$4 sm:$0xff]  }
  0x61   :  { %195 = vmatpush1.bf16.msra.mxu0 %v4470_v12  ;;  %v4548_v1 = vld [vmem:[#allocation5 + $0x160] ss:$16 sps:$4 sm:$0xff]   ;;  %v4549_v2 = vld [vmem:[#allocation5 + $0x184] ss:$16 sps:$4 sm:$0xff]   ;;  %v4553_v3 = vld [vmem:[#allocation5 + $0x18c] ss:$16 sps:$4 sm:$0xff]  }
  0x62   :  { %196 = vmatprep.subr.bf16.mxu0 %v4471_v13  ;;  %v4551_v4 = vld [vmem:[#allocation5 + $0x188] ss:$16 sps:$4 sm:$0xff]   ;;  %v4554_v5 = vld [vmem:[#allocation5 + $0x180] ss:$16 sps:$4 sm:$0xff]   ;;  %v4555_v6 = vld [vmem:[#allocation5 + $0x1a4] ss:$16 sps:$4 sm:$0xff]  }
  0x63   :  { %728 = vmatpush1.bf16.msra.mxu1 %v4506_v37  ;;  %v4559_v7 = vld [vmem:[#allocation5 + $0x1ac] ss:$16 sps:$4 sm:$0xff]   ;;  %v4557_v8 = vld [vmem:[#allocation5 + $0x1a8] ss:$16 sps:$4 sm:$0xff]   ;;  %v4560_v9 = vld [vmem:[#allocation5 + $0x1a0] ss:$16 sps:$4 sm:$0xff]  }
  0x64   :  { %729 = vmatprep.subr.bf16.mxu1 %v4507_v38  ;;  %v4561_v10 = vld [vmem:[#allocation5 + $0x1c4] ss:$16 sps:$4 sm:$0xff]   ;;  %v4565_v11 = vld [vmem:[#allocation5 + $0x1cc] ss:$16 sps:$4 sm:$0xff]   ;;  %v4563_v12 = vld [vmem:[#allocation5 + $0x1c8] ss:$16 sps:$4 sm:$0xff]  }
  0x65   :  { %197 = vmatpush1.bf16.msra.mxu0 %v4473_v14  ;;  %v4566_v13 = vld [vmem:[#allocation5 + $0x1c0] ss:$16 sps:$4 sm:$0xff]   ;;  %v4567_v14 = vld [vmem:[#allocation5 + $0x1e4] ss:$16 sps:$4 sm:$0xff]  }
  0x66   :  { %198 = vmatprep.subr.bf16.mxu0 %v4474_v15  ;;  %v4571_v15 = vld [vmem:[#allocation5 + $0x1ec] ss:$16 sps:$4 sm:$0xff]  }
  0x67   :  { %730 = vmatpush1.bf16.msra.mxu1 %v4512_v41 }
  0x68   :  { %731 = vmatprep.subr.bf16.mxu1 %v4513_v42 }
  0x69   :  { %199 = vmatpush1.bf16.msra.mxu0 %v4476_v16  ;;  %v4569_v16 = vld [vmem:[#allocation5 + $0x1e8] ss:$16 sps:$4 sm:$0xff]  }
  0x6a   :  { %760 = vmatprep.subr.bf16.mxu0 %v4481_v19 }
  0x6b   :  { %732 = vmatpush1.bf16.msra.mxu1 %v4518_v45 }
  0x6c   :  { %217 = vmatmul.mubr.bf16.vlgmr.msra.gmra.mrb[0].mxu0 %v87_v17  ;;  %733 = vmatprep.subr.bf16.mxu1 %v4519_v46  ;;  %v4572_v17 = vld [vmem:[#allocation5 + $0x1e0] ss:$16 sps:$4 sm:$0xff]  }
  0x6d   :  { %761 = vmatpush1.bf16.msra.mxu0 %v4479_v20 }
  0x6e   :  { %762 = vmatprep.subr.bf16.mxu0 %v4487_v23 }
  0x6f   :  { %734 = vmatpush1.bf16.msra.mxu1 %v4524_v49 }
  0x70   :  { %735 = vmatprep.subr.bf16.mxu1 %v4525_v50 }
  0x71   :  { %763 = vmatpush1.bf16.msra.mxu0 %v4485_v24 }
  0x72   :  { %764 = vmatprep.subr.bf16.mxu0 %v4493_v27 }
  0x73   :  { %736 = vmatpush1.bf16.msra.mxu1 %v4530_v53 }
  0x74   :  { %737 = vmatprep.subr.bf16.mxu1 %v4531_v54 }
  0x75   :  { %765 = vmatpush1.bf16.msra.mxu0 %v4491_v28 }
  0x76   :  { %766 = vmatprep.subr.bf16.mxu0 %v4499_v31 }
  0x77   :  { %738 = vmatpush1.bf16.msra.mxu1 %v4536_v57 }
  0x78   :  { %739 = vmatprep.subr.bf16.mxu1 %v4537_v58 }
  0x79   :  { %767 = vmatpush1.bf16.msra.mxu0 %v4497_v32 }
  0x7a   :  { %768 = vmatprep.subr.bf16.mxu0 %v4505_v35 }
  0x7b   :  { %740 = vmatpush1.bf16.msra.mxu1 %v4542_v61 }
  0x7c   :  { %741 = vmatprep.subr.bf16.mxu1 %v4543_v62  ;;  %v271_v62 = vlaneseq }
  0x7d   :  { %769 = vmatpush1.bf16.msra.mxu0 %v4503_v36 }
  0x7e   :  { %770 = vmatprep.subr.bf16.mxu0 %v4511_v39 }
  0x7f   :  { %742 = vmatpush1.bf16.msra.mxu1 %v4548_v1 }
  0x80   :  { %743 = vmatprep.subr.bf16.mxu1 %v4549_v2 }
  0x81   :  { %771 = vmatpush1.bf16.msra.mxu0 %v4509_v40 }
  0x82   :  { %772 = vmatprep.subr.bf16.mxu0 %v4517_v43 }
  0x83   :  { %744 = vmatpush1.bf16.msra.mxu1 %v4554_v5 }
  0x84   :  { %745 = vmatprep.subr.bf16.mxu1 %v4555_v6  ;;  %v80_v6 = vld [vmem:[%s5540_s5] sm:$0x3] }
  0x85   :  { %773 = vmatpush1.bf16.msra.mxu0 %v4515_v44 }
  0x86   :  { %774 = vmatprep.subr.bf16.mxu0 %v4523_v47 }
  0x87   :  { %746 = vmatpush1.bf16.msra.mxu1 %v4560_v9 }
  0x88   :  { %747 = vmatprep.subr.bf16.mxu1 %v4561_v10 }
  0x89   :  { %775 = vmatpush1.bf16.msra.mxu0 %v4521_v48 }
  0x8a   :  { %776 = vmatprep.subr.bf16.mxu0 %v4529_v51 }
  0x8b   :  { %748 = vmatpush1.bf16.msra.mxu1 %v4566_v13 }
  0x8c   :  { %749 = vmatprep.subr.bf16.mxu1 %v4567_v14 }
  0x8d   :  { %777 = vmatpush1.bf16.msra.mxu0 %v4527_v52 }
  0x8e   :  { %778 = vmatprep.subr.bf16.mxu0 %v4535_v55 }
  0x8f   :  { %750 = vmatpush1.bf16.msra.mxu1 %v4572_v17 }
  0x91   :  { %779 = vmatpush1.bf16.msra.mxu0 %v4533_v56 }
  0x92   :  { %780 = vmatprep.subr.bf16.mxu0 %v4541_v59 }
  0x95   :  { %781 = vmatpush1.bf16.msra.mxu0 %v4539_v60  ;;  %v5248_v60 = vmov 1966171168  }
  0x96   :  { %782 = vmatprep.subr.bf16.mxu0 %v4547_v63  ;;  %v269_v61 = vunpack.c.l.s4 %v5248_v60  ;;  %v4615_v60 = vld [vmem:[#allocation7 + $0xe0] ss:$16 sps:$4 sm:$0xff]  }
  0x98   :  { %v270_v63 = vunpack.c.0.s8 %v269_v61  ;;  %v4618_v61 = vld [vmem:[#allocation7 + $0xe8] ss:$16 sps:$4 sm:$0xff]  }
  0x99   :  { %783 = vmatpush1.bf16.msra.mxu0 %v4545_v0  ;;  %v5355_v0 = vshrl.u32 %v271_v62, 7  ;;  %v4623_v62 = vld [vmem:[#allocation7 + $0x104] ss:$16 sps:$4 sm:$0xff]  }
  0x9a   :  { %784 = vmatprep.subr.bf16.mxu0 %v4553_v3 }
  0x9b   :  { %v5358_v2 = vsub.s32 %v270_v63, %v5355_v0  ;;  %v5369_v9 = vsub.s32 1, %v5355_v0  ;;  %v4626_v63 = vld [vmem:[#allocation7 + $0x10c] ss:$16 sps:$4 sm:$0xff]  }
  0x9d   :  { %785 = vmatpush1.bf16.msra.mxu0 %v4551_v4 }
  0x9e   :  { %786 = vmatprep.subr.bf16.mxu0 %v4559_v7 }
  0xa1   :  { %787 = vmatpush1.bf16.msra.mxu0 %v4557_v8  ;;  %v5366_v8 = vsub.s32 0, %v5355_v0 }
  0xa2   :  { %788 = vmatprep.subr.bf16.mxu0 %v4565_v11 }
  0xa5   :  { %789 = vmatpush1.bf16.msra.mxu0 %v4563_v12 }
  0xa6   :  { %790 = vmatprep.subr.bf16.mxu0 %v4571_v15 }
  0xa9   :  { %791 = vmatpush1.bf16.msra.mxu0 %v4569_v16 }
 0x13f   :  { %v5349_v18 = vpop.f32.mrb[0].mxu0 }
 0x140   :  { %v225_v19 = vrot.slane %v5349_v18, 4  ;;  %v239_v20 = vmul.f32 %v5349_v18, %v5349_v18  ;;  %v220_v21 = vpop.f32.mrb[1].mxu0 }
 0x141   :  { %v231_v22 = vrot.slane %v220_v21, 4  ;;  %v240_v23 = vmul.f32 %v220_v21, %v220_v21  ;;  %v222_v24 = vpop.f32.mrb[2].mxu0 }
 0x142   :  { %v226_v25 = vadd.f32 %v225_v19, %v5349_v18  ;;  %v241_v26 = vrot.slane %v239_v20, 4  ;;  %v223_v27 = vpop.f32.mrb[3].mxu0 }
 0x143   :  { %v232_v28 = vadd.f32 %v231_v22, %v220_v21  ;;  %v247_v29 = vrot.slane %v240_v23, 4 }
 0x144   :  { %v227_v30 = vrot.slane %v226_v25, 2  ;;  %v242_v31 = vadd.f32 %v241_v26, %v239_v20  ;;  %v81_v20 = vld [vmem:[%s5540_s5 + $0x2] sm:$0x3] }
 0x145   :  { %v233_v32 = vrot.slane %v232_v28, 2  ;;  %v248_v33 = vadd.f32 %v247_v29, %v240_v23 }
 0x146   :  { %v228_v34 = vadd.f32 %v227_v30, %v226_v25  ;;  %v243_v35 = vrot.slane %v242_v31, 2  ;;  %v4575_v30 = vld [vmem:[#allocation7 + $0x4] ss:$16 sps:$4 sm:$0xff]  }
 0x147   :  { %v234_v36 = vadd.f32 %v233_v32, %v232_v28  ;;  %v249_v37 = vrot.slane %v248_v33, 2  ;;  %v4573_v32 = vld [vmem:[#allocation7] ss:$16 sps:$4 sm:$0xff]   ;;  %1771 = vmatprep.subr.bf16.mxu1 %v4575_v30  ;;  %v4665_v30 = vld [vmem:[#allocation7 + $0x1e4] ss:$16 sps:$4 sm:$0xff]  }
 0x148   :  { %v229_v38 = vrot.slane %v228_v34, 1  ;;  %v244_v39 = vadd.f32 %v243_v35, %v242_v31  ;;  %v4578_v31 = vld [vmem:[#allocation7 + $0xc] ss:$16 sps:$4 sm:$0xff]  }
 0x149   :  { %v235_v40 = vrot.slane %v234_v36, 1  ;;  %v250_v41 = vadd.f32 %v249_v37, %v248_v33  ;;  %v4576_v33 = vld [vmem:[#allocation7 + $0x8] ss:$16 sps:$4 sm:$0xff]   ;;  %1853 = vmatprep.subr.bf16.mxu0 %v4578_v31  ;;  %v4584_v35 = vld [vmem:[#allocation7 + $0x2c] ss:$16 sps:$4 sm:$0xff]  }
 0x14a   :  { %v230_v42 = vadd.f32 %v229_v38, %v228_v34  ;;  %v245_v43 = vrot.slane %v244_v39, 1  ;;  %v4581_v34 = vld [vmem:[#allocation7 + $0x24] ss:$16 sps:$4 sm:$0xff]   ;;  %v4582_v37 = vld [vmem:[#allocation7 + $0x28] ss:$16 sps:$4 sm:$0xff]  }
 0x14b   :  { %v236_v44 = vadd.f32 %v235_v40, %v234_v36  ;;  %v251_v45 = vrot.slane %v250_v41, 1  ;;  %v4579_v36 = vld [vmem:[#allocation7 + $0x20] ss:$16 sps:$4 sm:$0xff]   ;;  %v4587_v38 = vld [vmem:[#allocation7 + $0x44] ss:$16 sps:$4 sm:$0xff]  }
 0x14c   :  { %v237_v46 = vmul.f32 0.125, %v230_v42  ;;  %v246_v47 = vadd.f32 %v245_v43, %v244_v39  ;;  %v4590_v39 = vld [vmem:[#allocation7 + $0x4c] ss:$16 sps:$4 sm:$0xff]   ;;  %v4585_v40 = vld [vmem:[#allocation7 + $0x40] ss:$16 sps:$4 sm:$0xff]  }
 0x14d   :  { %v238_v48 = vmul.f32 0.125, %v236_v44  ;;  %v252_v49 = vadd.f32 %v251_v45, %v250_v41  ;;  %v4588_v41 = vld [vmem:[#allocation7 + $0x48] ss:$16 sps:$4 sm:$0xff]   ;;  %v4593_v42 = vld [vmem:[#allocation7 + $0x64] ss:$16 sps:$4 sm:$0xff]  }
 0x14e   :  { %v253_v50 = vmul.f32 0.125, %v246_v47  ;;  %v255_v51 = vmul.f32 %v237_v46, %v237_v46  ;;  %v4596_v43 = vld [vmem:[#allocation7 + $0x6c] ss:$16 sps:$4 sm:$0xff]   ;;  %v4591_v44 = vld [vmem:[#allocation7 + $0x60] ss:$16 sps:$4 sm:$0xff]  }
 0x14f   :  { %v254_v52 = vmul.f32 0.125, %v252_v49  ;;  %v256_v53 = vmul.f32 %v238_v48, %v238_v48  ;;  %v4594_v45 = vld [vmem:[#allocation7 + $0x68] ss:$16 sps:$4 sm:$0xff]   ;;  %v4602_v47 = vld [vmem:[#allocation7 + $0x8c] ss:$16 sps:$4 sm:$0xff]  }
 0x150   :  { %v257_v54 = vsub.f32 %v253_v50, %v255_v51  ;;  %v4600_v49 = vld [vmem:[#allocation7 + $0x88] ss:$16 sps:$4 sm:$0xff]   ;;  %v4605_v50 = vld [vmem:[#allocation7 + $0xa4] ss:$16 sps:$4 sm:$0xff]   ;;  %v4608_v51 = vld [vmem:[#allocation7 + $0xac] ss:$16 sps:$4 sm:$0xff]  }
 0x151   :  { %v258_v55 = vsub.f32 %v254_v52, %v256_v53  ;;  %v4603_v52 = vld [vmem:[#allocation7 + $0xa0] ss:$16 sps:$4 sm:$0xff]   ;;  %v4606_v53 = vld [vmem:[#allocation7 + $0xa8] ss:$16 sps:$4 sm:$0xff]   ;;  %v4668_v31 = vld [vmem:[#allocation7 + $0x1ec] ss:$16 sps:$4 sm:$0xff]  }
 0x152   :  { %v259_v56 = vmax.f32 %v257_v54, 0.0  ;;  %v4611_v54 = vld [vmem:[#allocation7 + $0xc4] ss:$16 sps:$4 sm:$0xff]  }
 0x153   :  { %v260_v57 = vmax.f32 %v258_v55, 0.0  ;;  %v4614_v55 = vld [vmem:[#allocation7 + $0xcc] ss:$16 sps:$4 sm:$0xff]  }
 0x154   :  { %v261_v58 = vadd.f32 1e-05, %v259_v56  ;;  %v4609_v56 = vld [vmem:[#allocation7 + $0xc0] ss:$16 sps:$4 sm:$0xff]  }
 0x155   :  { %v262_v59 = vadd.f32 1e-05, %v260_v57  ;;  %v4612_v57 = vld [vmem:[#allocation7 + $0xc8] ss:$16 sps:$4 sm:$0xff]  }
 0x156   :  { %5085 = vrsqrt.f32 %v261_v58  ;;  %v4617_v58 = vld [vmem:[#allocation7 + $0xe4] ss:$16 sps:$4 sm:$0xff]  }
 0x157   :  { %5087 = vrsqrt.f32 %v262_v59  ;;  %v4620_v59 = vld [vmem:[#allocation7 + $0xec] ss:$16 sps:$4 sm:$0xff]  }
 0x160   :  { %v5086_v1 = vpop.eup %5085 }
 0x161   :  { %v5088_v3 = vpop.eup %5087 }
 0x162   :  { %v267_v4 = vcombine.low %v5086_v1, %v5088_v3  ;;  %v4621_v1 = vld [vmem:[#allocation7 + $0x100] ss:$16 sps:$4 sm:$0xff]   ;;  %v4624_v3 = vld [vmem:[#allocation7 + $0x108] ss:$16 sps:$4 sm:$0xff]  }
 0x164   :  { %v274_v5 = vrot.slane %v267_v4, %v5358_v2  ;;  %v4629_v4 = vld [vmem:[#allocation7 + $0x124] ss:$16 sps:$4 sm:$0xff]  }
 0x166   :  { %v281_v7 = vrot.slane %v274_v5, %v5358_v2  ;;  %v4632_v5 = vld [vmem:[#allocation7 + $0x12c] ss:$16 sps:$4 sm:$0xff]  }
 0x168   :  { %v283_v10 = vmul.f32 %v281_v7, %v80_v6  ;;  %v4627_v6 = vld [vmem:[#allocation7 + $0x120] ss:$16 sps:$4 sm:$0xff]   ;;  %v4630_v7 = vld [vmem:[#allocation7 + $0x128] ss:$16 sps:$4 sm:$0xff]  }
 0x16a   :  { %v288_v11 = vrot.slane %v283_v10, %v5366_v8  ;;  %v292_v12 = vrot.slane %v283_v10, %v5369_v9  ;;  %v4635_v10 = vld [vmem:[#allocation7 + $0x144] ss:$16 sps:$4 sm:$0xff]  }
 0x16c   :  { %v295_v13 = vmul.f32 %v288_v11, %v237_v46  ;;  %v296_v14 = vmul.f32 %v292_v12, %v238_v48  ;;  %v317_v15 = vmul.f32 %v292_v12, %v220_v21  ;;  %v316_v16 = vmul.f32 %v288_v11, %v5349_v18  ;;  %v4599_v46 = vld [vmem:[#allocation7 + $0x84] ss:$16 sps:$4 sm:$0xff]   ;;  %v4597_v48 = vld [vmem:[#allocation7 + $0x80] ss:$16 sps:$4 sm:$0xff]   ;;  %v4638_v11 = vld [vmem:[#allocation7 + $0x14c] ss:$16 sps:$4 sm:$0xff]  }
 0x16d   :  { %v4633_v12 = vld [vmem:[#allocation7 + $0x140] ss:$16 sps:$4 sm:$0xff]  }
 0x16e   :  { %v299_v17 = vcombine.low %v295_v13, %v296_v14  ;;  %v4636_v13 = vld [vmem:[#allocation7 + $0x148] ss:$16 sps:$4 sm:$0xff]   ;;  %v4641_v14 = vld [vmem:[#allocation7 + $0x164] ss:$16 sps:$4 sm:$0xff]  }
 0x170   :  { %v306_v19 = vrot.slane %v299_v17, %v5358_v2  ;;  %v4642_v17 = vld [vmem:[#allocation7 + $0x168] ss:$16 sps:$4 sm:$0xff]  }
 0x172   :  { %v313_v22 = vrot.slane %v306_v19, %v5358_v2  ;;  %v4647_v19 = vld [vmem:[#allocation7 + $0x184] ss:$16 sps:$4 sm:$0xff]  }
 0x174   :  { %v315_v23 = vsub.f32 %v81_v20, %v313_v22  ;;  %v4650_v20 = vld [vmem:[#allocation7 + $0x18c] ss:$16 sps:$4 sm:$0xff]   ;;  %v4645_v22 = vld [vmem:[#allocation7 + $0x180] ss:$16 sps:$4 sm:$0xff]  }
 0x176   :  { %v326_v24 = vrot.slane %v315_v23, %v5369_v9  ;;  %v322_v25 = vrot.slane %v315_v23, %v5366_v8  ;;  %v4648_v23 = vld [vmem:[#allocation7 + $0x188] ss:$16 sps:$4 sm:$0xff]  }
 0x178   :  { %v330_v26 = vadd.f32 %v326_v24, %v317_v15  ;;  %v329_v27 = vadd.f32 %v322_v25, %v316_v16  ;;  %v4644_v15 = vld [vmem:[#allocation7 + $0x16c] ss:$16 sps:$4 sm:$0xff]   ;;  %v4639_v16 = vld [vmem:[#allocation7 + $0x160] ss:$16 sps:$4 sm:$0xff]   ;;  %v4653_v24 = vld [vmem:[#allocation7 + $0x1a4] ss:$16 sps:$4 sm:$0xff]  }
 0x179   :  { %v4651_v25 = vld [vmem:[#allocation7 + $0x1a0] ss:$16 sps:$4 sm:$0xff]  }
 0x17a   :  { %v332_v28 = vmax.f32 %v330_v26, 0.0  ;;  %v331_v21 = vmax.f32 %v329_v27, 0.0  ;;  %v4654_v26 = vld [vmem:[#allocation7 + $0x1a8] ss:$16 sps:$4 sm:$0xff]   ;;  %v4656_v27 = vld [vmem:[#allocation7 + $0x1ac] ss:$16 sps:$4 sm:$0xff]  }
 0x17c   :  { %v334_v29 = vpack.c.bf16 %v332_v28, %v332_v28  ;;  %v333_v18 = vpack.c.bf16 %v331_v21, %v331_v21  ;;  %v4659_v28 = vld [vmem:[#allocation7 + $0x1c4] ss:$16 sps:$4 sm:$0xff]   ;;  %v4662_v21 = vld [vmem:[#allocation7 + $0x1cc] ss:$16 sps:$4 sm:$0xff]  }
 0x17e   :  { %751 = vmatprep.mubr.bf16.mxu1 %v334_v29  ;;  %792 = vmatprep.mubr.bf16.mxu0 %v334_v29  ;;  %v4657_v29 = vld [vmem:[#allocation7 + $0x1c0] ss:$16 sps:$4 sm:$0xff]  }
 0x17f   :  { %752 = vmatmul.mubr.bf16.vlgmr.msra.gmra.mrb[0].mxu1 %v333_v18  ;;  %793 = vmatmul.mubr.bf16.vlgmr.msra.gmra.mrb[4].mxu0 %v333_v18  ;;  %v4660_v18 = vld [vmem:[#allocation7 + $0x1c8] ss:$16 sps:$4 sm:$0xff]  }
 0x180   :  { %1772 = vmatpush1.bf16.msra.mxu1 %v4573_v32  ;;  %1854 = vmatpush1.bf16.msra.mxu0 %v4576_v33  ;;  %v4663_v32 = vld [vmem:[#allocation7 + $0x1e0] ss:$16 sps:$4 sm:$0xff]   ;;  %v4666_v33 = vld [vmem:[#allocation7 + $0x1e8] ss:$16 sps:$4 sm:$0xff]  }
 0x181   :  { %1773 = vmatprep.subr.bf16.mxu1 %v4581_v34  ;;  %1855 = vmatprep.subr.bf16.mxu0 %v4584_v35  ;;  %v4671_v34 = vld [vmem:[#allocation7 + $0x204] ss:$16 sps:$4 sm:$0xff]   ;;  %v4674_v35 = vld [vmem:[#allocation7 + $0x20c] ss:$16 sps:$4 sm:$0xff]  }
 0x184   :  { %1774 = vmatpush1.bf16.msra.mxu1 %v4579_v36  ;;  %1856 = vmatpush1.bf16.msra.mxu0 %v4582_v37 }
 0x185   :  { %1775 = vmatprep.subr.bf16.mxu1 %v4587_v38  ;;  %1857 = vmatprep.subr.bf16.mxu0 %v4590_v39 }
 0x188   :  { %1776 = vmatpush1.bf16.msra.mxu1 %v4585_v40  ;;  %1858 = vmatpush1.bf16.msra.mxu0 %v4588_v41 }
 0x189   :  { %1777 = vmatprep.subr.bf16.mxu1 %v4593_v42  ;;  %1859 = vmatprep.subr.bf16.mxu0 %v4596_v43 }
 0x18c   :  { %1778 = vmatpush1.bf16.msra.mxu1 %v4591_v44  ;;  %1860 = vmatpush1.bf16.msra.mxu0 %v4594_v45 }
 0x18d   :  { %1779 = vmatprep.subr.bf16.mxu1 %v4599_v46  ;;  %1861 = vmatprep.subr.bf16.mxu0 %v4602_v47 }
 0x190   :  { %1780 = vmatpush1.bf16.msra.mxu1 %v4597_v48  ;;  %1862 = vmatpush1.bf16.msra.mxu0 %v4600_v49 }
 0x191   :  { %1781 = vmatprep.subr.bf16.mxu1 %v4605_v50  ;;  %1863 = vmatprep.subr.bf16.mxu0 %v4608_v51 }
 0x194   :  { %1782 = vmatpush1.bf16.msra.mxu1 %v4603_v52  ;;  %1864 = vmatpush1.bf16.msra.mxu0 %v4606_v53 }
 0x195   :  { %1783 = vmatprep.subr.bf16.mxu1 %v4611_v54  ;;  %1865 = vmatprep.subr.bf16.mxu0 %v4614_v55 }
 0x198   :  { %1784 = vmatpush1.bf16.msra.mxu1 %v4609_v56  ;;  %1866 = vmatpush1.bf16.msra.mxu0 %v4612_v57 }
 0x199   :  { %1785 = vmatprep.subr.bf16.mxu1 %v4617_v58  ;;  %1867 = vmatprep.subr.bf16.mxu0 %v4620_v59 }
 0x19c   :  { %1786 = vmatpush1.bf16.msra.mxu1 %v4615_v60  ;;  %1868 = vmatpush1.bf16.msra.mxu0 %v4618_v61 }
 0x19d   :  { %1787 = vmatprep.subr.bf16.mxu1 %v4623_v62  ;;  %1869 = vmatprep.subr.bf16.mxu0 %v4626_v63 }
 0x1a0   :  { %1788 = vmatpush1.bf16.msra.mxu1 %v4621_v1  ;;  %1870 = vmatpush1.bf16.msra.mxu0 %v4624_v3 }
 0x1a1   :  { %1789 = vmatprep.subr.bf16.mxu1 %v4629_v4  ;;  %1871 = vmatprep.subr.bf16.mxu0 %v4632_v5 }
 0x1a4   :  { %1790 = vmatpush1.bf16.msra.mxu1 %v4627_v6  ;;  %1872 = vmatpush1.bf16.msra.mxu0 %v4630_v7 }
 0x1a5   :  { %1791 = vmatprep.subr.bf16.mxu1 %v4635_v10  ;;  %1873 = vmatprep.subr.bf16.mxu0 %v4638_v11 }
 0x1a8   :  { %1792 = vmatpush1.bf16.msra.mxu1 %v4633_v12  ;;  %1874 = vmatpush1.bf16.msra.mxu0 %v4636_v13 }
 0x1a9   :  { %1793 = vmatprep.subr.bf16.mxu1 %v4641_v14  ;;  %1875 = vmatprep.subr.bf16.mxu0 %v4644_v15 }
 0x1ac   :  { %1794 = vmatpush1.bf16.msra.mxu1 %v4639_v16  ;;  %1876 = vmatpush1.bf16.msra.mxu0 %v4642_v17 }
 0x1ad   :  { %1795 = vmatprep.subr.bf16.mxu1 %v4647_v19  ;;  %1877 = vmatprep.subr.bf16.mxu0 %v4650_v20 }
 0x1b0   :  { %1796 = vmatpush1.bf16.msra.mxu1 %v4645_v22  ;;  %1878 = vmatpush1.bf16.msra.mxu0 %v4648_v23 }
 0x1b1   :  { %1797 = vmatprep.subr.bf16.mxu1 %v4653_v24  ;;  %1879 = vmatprep.subr.bf16.mxu0 %v4656_v27 }
 0x1b4   :  { %1798 = vmatpush1.bf16.msra.mxu1 %v4651_v25  ;;  %1880 = vmatpush1.bf16.msra.mxu0 %v4654_v26 }
 0x1b5   :  { %1799 = vmatprep.subr.bf16.mxu1 %v4659_v28  ;;  %1881 = vmatprep.subr.bf16.mxu0 %v4662_v21 }
 0x1b8   :  { %1800 = vmatpush1.bf16.msra.mxu1 %v4657_v29  ;;  %1882 = vmatpush1.bf16.msra.mxu0 %v4660_v18 }
 0x1b9   :  { %1801 = vmatprep.subr.bf16.mxu1 %v4665_v30  ;;  %1883 = vmatprep.subr.bf16.mxu0 %v4668_v31 }
 0x1bc   :  { %1802 = vmatpush1.bf16.msra.mxu1 %v4663_v32  ;;  %1884 = vmatpush1.bf16.msra.mxu0 %v4666_v33 }
 0x1bd   :  { %1812 = vmatprep.subr.bf16.mxu1 %v4671_v34  ;;  %1894 = vmatprep.subr.bf16.mxu0 %v4674_v35 }
 0x252   :  { %v5381_v36 = vpop.f32.mrb[0].mxu1  ;;  %v5383_v37 = vpop.f32.mrb[4].mxu0 }
 0x253   :  { %v801_v38 = vrot.slane %v5381_v36, 4  ;;  %v829_v39 = vmul.f32 %v5381_v36, %v5381_v36  ;;  %v813_v40 = vrot.slane %v5383_v37, 4  ;;  %v831_v41 = vmul.f32 %v5383_v37, %v5383_v37  ;;  %v5391_v42 = vpop.f32.mrb[1].mxu1  ;;  %v5393_v43 = vpop.f32.mrb[5].mxu0 }
 0x254   :  { %v807_v44 = vrot.slane %v5391_v42, 4  ;;  %v830_v45 = vmul.f32 %v5391_v42, %v5391_v42  ;;  %v819_v46 = vrot.slane %v5393_v43, 4  ;;  %v832_v47 = vmul.f32 %v5393_v43, %v5393_v43  ;;  %v757_v48 = vpop.f32.mrb[2].mxu1  ;;  %v798_v49 = vpop.f32.mrb[6].mxu0 }
 0x255   :  { %v802_v50 = vadd.f32 %v801_v38, %v5381_v36  ;;  %v833_v51 = vrot.slane %v829_v39, 4  ;;  %v814_v52 = vadd.f32 %v813_v40, %v5383_v37  ;;  %v845_v53 = vrot.slane %v831_v41, 4  ;;  %v758_v54 = vpop.f32.mrb[3].mxu1  ;;  %v799_v55 = vpop.f32.mrb[7].mxu0 }
 0x256   :  { %v808_v56 = vadd.f32 %v807_v44, %v5391_v42  ;;  %v839_v57 = vrot.slane %v830_v45, 4  ;;  %v820_v58 = vadd.f32 %v819_v46, %v5393_v43  ;;  %v851_v59 = vrot.slane %v832_v47, 4 }
 0x257   :  { %v803_v60 = vrot.slane %v802_v50, 2  ;;  %v834_v61 = vadd.f32 %v833_v51, %v829_v39  ;;  %v815_v62 = vrot.slane %v814_v52, 2  ;;  %v846_v63 = vadd.f32 %v845_v53, %v831_v41 }
 0x258   :  { %v809_v1 = vrot.slane %v808_v56, 2  ;;  %v840_v3 = vadd.f32 %v839_v57, %v830_v45  ;;  %v821_v4 = vrot.slane %v820_v58, 2  ;;  %v852_v5 = vadd.f32 %v851_v59, %v832_v47 }
 0x259   :  { %v804_v6 = vadd.f32 %v803_v60, %v802_v50  ;;  %v835_v7 = vrot.slane %v834_v61, 2  ;;  %v816_v10 = vadd.f32 %v815_v62, %v814_v52  ;;  %v847_v11 = vrot.slane %v846_v63, 2 }
 0x25a   :  { %v810_v12 = vadd.f32 %v809_v1, %v808_v56  ;;  %v841_v13 = vrot.slane %v840_v3, 2  ;;  %v822_v14 = vadd.f32 %v821_v4, %v820_v58  ;;  %v853_v15 = vrot.slane %v852_v5, 2 }
 0x25b   :  { %v805_v16 = vrot.slane %v804_v6, 1  ;;  %v836_v17 = vadd.f32 %v835_v7, %v834_v61  ;;  %v817_v19 = vrot.slane %v816_v10, 1  ;;  %v848_v20 = vadd.f32 %v847_v11, %v846_v63 }
 0x25c   :  { %v811_v22 = vrot.slane %v810_v12, 1  ;;  %v842_v23 = vadd.f32 %v841_v13, %v840_v3  ;;  %v823_v24 = vrot.slane %v822_v14, 1  ;;  %v854_v25 = vadd.f32 %v853_v15, %v852_v5  ;;  %v82_v13 = vld [vmem:[%s5540_s5 + $0x4] sm:$0xf] }
 0x25d   :  { %v806_v26 = vadd.f32 %v805_v16, %v804_v6  ;;  %v837_v27 = vrot.slane %v836_v17, 1  ;;  %v818_v28 = vadd.f32 %v817_v19, %v816_v10  ;;  %v849_v21 = vrot.slane %v848_v20, 1 }
 0x25e   :  { %v812_v29 = vadd.f32 %v811_v22, %v810_v12  ;;  %v843_v18 = vrot.slane %v842_v23, 1  ;;  %v824_v30 = vadd.f32 %v823_v24, %v822_v14  ;;  %v855_v31 = vrot.slane %v854_v25, 1 }
 0x25f   :  { %v825_v32 = vmul.f32 0.125, %v806_v26  ;;  %v838_v33 = vadd.f32 %v837_v27, %v836_v17  ;;  %v827_v34 = vmul.f32 0.125, %v818_v28  ;;  %v850_v35 = vadd.f32 %v849_v21, %v848_v20 }
 0x260   :  { %v826_v38 = vmul.f32 0.125, %v812_v29  ;;  %v844_v39 = vadd.f32 %v843_v18, %v842_v23  ;;  %v828_v40 = vmul.f32 0.125, %v824_v30  ;;  %v856_v41 = vadd.f32 %v855_v31, %v854_v25 }
 0x261   :  { %v857_v44 = vmul.f32 0.125, %v838_v33  ;;  %v861_v45 = vmul.f32 %v825_v32, %v825_v32  ;;  %v859_v46 = vmul.f32 0.125, %v850_v35  ;;  %v863_v47 = vmul.f32 %v827_v34, %v827_v34 }
 0x262   :  { %v858_v48 = vmul.f32 0.125, %v844_v39  ;;  %v862_v49 = vmul.f32 %v826_v38, %v826_v38  ;;  %v860_v50 = vmul.f32 0.125, %v856_v41  ;;  %v864_v51 = vmul.f32 %v828_v40, %v828_v40 }
 0x263   :  { %v865_v52 = vsub.f32 %v857_v44, %v861_v45  ;;  %v867_v53 = vsub.f32 %v859_v46, %v863_v47  ;;  %v5412_v15 = vsub.s32 2, %v5355_v0  ;;  %v5415_v16 = vsub.s32 3, %v5355_v0 }
 0x264   :  { %v866_v54 = vsub.f32 %v858_v48, %v862_v49  ;;  %v868_v55 = vsub.f32 %v860_v50, %v864_v51  ;;  %v4669_v50 = vld [vmem:[#allocation7 + $0x200] ss:$16 sps:$4 sm:$0xff]   ;;  %v4672_v51 = vld [vmem:[#allocation7 + $0x208] ss:$16 sps:$4 sm:$0xff]  }
 0x265   :  { %v869_v56 = vmax.f32 %v865_v52, 0.0  ;;  %v871_v57 = vmax.f32 %v867_v53, 0.0  ;;  %v4677_v53 = vld [vmem:[#allocation7 + $0x224] ss:$16 sps:$4 sm:$0xff]  }
 0x266   :  { %v870_v58 = vmax.f32 %v866_v54, 0.0  ;;  %v872_v59 = vmax.f32 %v868_v55, 0.0  ;;  %v4680_v54 = vld [vmem:[#allocation7 + $0x22c] ss:$16 sps:$4 sm:$0xff]  }
 0x267   :  { %v873_v60 = vadd.f32 1e-05, %v869_v56  ;;  %v875_v61 = vadd.f32 1e-05, %v871_v57  ;;  %v4675_v56 = vld [vmem:[#allocation7 + $0x220] ss:$16 sps:$4 sm:$0xff]  }
 0x268   :  { %v874_v62 = vadd.f32 1e-05, %v870_v58  ;;  %v876_v63 = vadd.f32 1e-05, %v872_v59  ;;  %v4678_v57 = vld [vmem:[#allocation7 + $0x228] ss:$16 sps:$4 sm:$0xff]  }
 0x269   :  { %5089 = vrsqrt.f32 %v873_v60  ;;  %v4683_v58 = vld [vmem:[#allocation7 + $0x244] ss:$16 sps:$4 sm:$0xff]   ;;  %v4686_v59 = vld [vmem:[#allocation7 + $0x24c] ss:$16 sps:$4 sm:$0xff]   ;;  %v4681_v60 = vld [vmem:[#allocation7 + $0x240] ss:$16 sps:$4 sm:$0xff]  }
 0x26a   :  { %5091 = vrsqrt.f32 %v875_v61  ;;  %v4684_v61 = vld [vmem:[#allocation7 + $0x248] ss:$16 sps:$4 sm:$0xff]  }
 0x26b   :  { %5093 = vrsqrt.f32 %v874_v62  ;;  %v4689_v62 = vld [vmem:[#allocation7 + $0x264] ss:$16 sps:$4 sm:$0xff]  }
 0x26c   :  { %5095 = vrsqrt.f32 %v876_v63  ;;  %v4692_v63 = vld [vmem:[#allocation7 + $0x26c] ss:$16 sps:$4 sm:$0xff]  }
 0x273   :  { %v5090_v1 = vpop.eup %5089 }
 0x274   :  { %v5092_v3 = vpop.eup %5091 }
 0x275   :  { %v5094_v4 = vpop.eup %5093 }
 0x276   :  { %v5096_v5 = vpop.eup %5095  ;;  %v885_v6 = vcombine.low %v5090_v1, %v5094_v4  ;;  %v4687_v1 = vld [vmem:[#allocation7 + $0x260] ss:$16 sps:$4 sm:$0xff]   ;;  %v4695_v4 = vld [vmem:[#allocation7 + $0x284] ss:$16 sps:$4 sm:$0xff]  }
 0x277   :  { %v886_v7 = vcombine.low %v5092_v3, %v5096_v5  ;;  %v4690_v3 = vld [vmem:[#allocation7 + $0x268] ss:$16 sps:$4 sm:$0xff]   ;;  %v4698_v5 = vld [vmem:[#allocation7 + $0x28c] ss:$16 sps:$4 sm:$0xff]  }
 0x278   :  { %v893_v10 = vrot.slane %v885_v6, %v5358_v2  ;;  %v4693_v6 = vld [vmem:[#allocation7 + $0x280] ss:$16 sps:$4 sm:$0xff]  }
 0x279   :  { %v900_v11 = vrot.slane %v886_v7, %v5358_v2  ;;  %v4696_v7 = vld [vmem:[#allocation7 + $0x288] ss:$16 sps:$4 sm:$0xff]  }
 0x27b   :  { %v901_v12 = vcombine.low %v893_v10, %v900_v11  ;;  %v4701_v10 = vld [vmem:[#allocation7 + $0x2a4] ss:$16 sps:$4 sm:$0xff]   ;;  %v4704_v11 = vld [vmem:[#allocation7 + $0x2ac] ss:$16 sps:$4 sm:$0xff]  }
 0x27d   :  { %v908_v14 = vrot.slane %v901_v12, %v5358_v2  ;;  %v4699_v12 = vld [vmem:[#allocation7 + $0x2a0] ss:$16 sps:$4 sm:$0xff]  }
 0x27f   :  { %v910_v17 = vmul.f32 %v908_v14, %v82_v13  ;;  %v4702_v13 = vld [vmem:[#allocation7 + $0x2a8] ss:$16 sps:$4 sm:$0xff]   ;;  %v4707_v14 = vld [vmem:[#allocation7 + $0x2c4] ss:$16 sps:$4 sm:$0xff]  }
 0x281   :  { %v923_v19 = vrot.slane %v910_v17, %v5412_v15  ;;  %v927_v20 = vrot.slane %v910_v17, %v5415_v16  ;;  %v915_v22 = vrot.slane %v910_v17, %v5366_v8  ;;  %v919_v23 = vrot.slane %v910_v17, %v5369_v9  ;;  %v4710_v17 = vld [vmem:[#allocation7 + $0x2cc] ss:$16 sps:$4 sm:$0xff]  }
 0x283   :  { %v934_v24 = vmul.f32 %v923_v19, %v827_v34  ;;  %v935_v25 = vmul.f32 %v927_v20, %v828_v40  ;;  %v969_v26 = vmul.f32 %v927_v20, %v5393_v43  ;;  %v932_v27 = vmul.f32 %v915_v22, %v825_v32  ;;  %v83_v34 = vld [vmem:[%s5540_s5 + $0x8] sm:$0xf] }
 0x284   :  { %v933_v28 = vmul.f32 %v919_v23, %v826_v38  ;;  %v967_v21 = vmul.f32 %v919_v23, %v5391_v42  ;;  %v966_v29 = vmul.f32 %v915_v22, %v5381_v36  ;;  %v968_v18 = vmul.f32 %v923_v19, %v5383_v37  ;;  %v4705_v19 = vld [vmem:[#allocation7 + $0x2c0] ss:$16 sps:$4 sm:$0xff]   ;;  %v4708_v20 = vld [vmem:[#allocation7 + $0x2c8] ss:$16 sps:$4 sm:$0xff]   ;;  %v4713_v22 = vld [vmem:[#allocation7 + $0x2e4] ss:$16 sps:$4 sm:$0xff]  }
 0x285   :  { %v941_v30 = vcombine.low %v934_v24, %v935_v25  ;;  %v4716_v23 = vld [vmem:[#allocation7 + $0x2ec] ss:$16 sps:$4 sm:$0xff]   ;;  %v4711_v24 = vld [vmem:[#allocation7 + $0x2e0] ss:$16 sps:$4 sm:$0xff]   ;;  %v4714_v25 = vld [vmem:[#allocation7 + $0x2e8] ss:$16 sps:$4 sm:$0xff]  }
 0x286   :  { %v940_v31 = vcombine.low %v932_v27, %v933_v28  ;;  %v4722_v27 = vld [vmem:[#allocation7 + $0x30c] ss:$16 sps:$4 sm:$0xff]   ;;  %v4717_v28 = vld [vmem:[#allocation7 + $0x300] ss:$16 sps:$4 sm:$0xff]  }
 0x287   :  { %v955_v33 = vrot.slane %v941_v30, %v5358_v2  ;;  %v4723_v30 = vld [vmem:[#allocation7 + $0x320] ss:$16 sps:$4 sm:$0xff]  }
 0x288   :  { %v948_v35 = vrot.slane %v940_v31, %v5358_v2  ;;  %v4726_v31 = vld [vmem:[#allocation7 + $0x328] ss:$16 sps:$4 sm:$0xff]  }
 0x28a   :  { %v956_v39 = vcombine.low %v948_v35, %v955_v33  ;;  %v4731_v33 = vld [vmem:[#allocation7 + $0x344] ss:$16 sps:$4 sm:$0xff]   ;;  %v4734_v35 = vld [vmem:[#allocation7 + $0x34c] ss:$16 sps:$4 sm:$0xff]  }
 0x28c   :  { %v963_v43 = vrot.slane %v956_v39, %v5358_v2  ;;  %v4729_v39 = vld [vmem:[#allocation7 + $0x340] ss:$16 sps:$4 sm:$0xff]  }
 0x28e   :  { %v965_v32 = vsub.f32 %v83_v34, %v963_v43  ;;  %v4732_v34 = vld [vmem:[#allocation7 + $0x348] ss:$16 sps:$4 sm:$0xff]   ;;  %v4737_v43 = vld [vmem:[#allocation7 + $0x364] ss:$16 sps:$4 sm:$0xff]  }
 0x290   :  { %v978_v42 = vrot.slane %v965_v32, %v5369_v9  ;;  %v974_v36 = vrot.slane %v965_v32, %v5366_v8  ;;  %v986_v37 = vrot.slane %v965_v32, %v5415_v16  ;;  %v982_v38 = vrot.slane %v965_v32, %v5412_v15  ;;  %v4740_v32 = vld [vmem:[#allocation7 + $0x36c] ss:$16 sps:$4 sm:$0xff]  }
 0x292   :  { %v992_v40 = vadd.f32 %v978_v42, %v967_v21  ;;  %v991_v41 = vadd.f32 %v974_v36, %v966_v29  ;;  %v994_v44 = vadd.f32 %v986_v37, %v969_v26  ;;  %v5435_v45 = vadd.f32 %v982_v38, %v968_v18  ;;  %v4719_v26 = vld [vmem:[#allocation7 + $0x304] ss:$16 sps:$4 sm:$0xff]   ;;  %v4720_v21 = vld [vmem:[#allocation7 + $0x308] ss:$16 sps:$4 sm:$0xff]   ;;  %v4728_v18 = vld [vmem:[#allocation7 + $0x32c] ss:$16 sps:$4 sm:$0xff]  }
 0x293   :  { %v4725_v29 = vld [vmem:[#allocation7 + $0x324] ss:$16 sps:$4 sm:$0xff]   ;;  %v4735_v42 = vld [vmem:[#allocation7 + $0x360] ss:$16 sps:$4 sm:$0xff]   ;;  %v4738_v36 = vld [vmem:[#allocation7 + $0x368] ss:$16 sps:$4 sm:$0xff]  }
 0x294   :  { %v996_v46 = vmax.f32 %v992_v40, 0.0  ;;  %v995_v47 = vmax.f32 %v991_v41, 0.0  ;;  %v998_v48 = vmax.f32 %v994_v44, 0.0  ;;  %v4743_v37 = vld [vmem:[#allocation7 + $0x384] ss:$16 sps:$4 sm:$0xff]  }
 0x295   :  { %v4746_v38 = vld [vmem:[#allocation7 + $0x38c] ss:$16 sps:$4 sm:$0xff]   ;;  %v4741_v40 = vld [vmem:[#allocation7 + $0x380] ss:$16 sps:$4 sm:$0xff]   ;;  %v4744_v41 = vld [vmem:[#allocation7 + $0x388] ss:$16 sps:$4 sm:$0xff]  }
 0x296   :  { %v1000_v49 = vpack.c.bf16 %v996_v46, %v996_v46  ;;  %v999_v52 = vpack.c.bf16 %v995_v47, %v995_v47  ;;  %v1002_v55 = vpack.c.bf16 %v998_v48, %v998_v48  ;;  %v4749_v44 = vld [vmem:[#allocation7 + $0x3a4] ss:$16 sps:$4 sm:$0xff]   ;;  %v4752_v46 = vld [vmem:[#allocation7 + $0x3ac] ss:$16 sps:$4 sm:$0xff]   ;;  %v4747_v47 = vld [vmem:[#allocation7 + $0x3a0] ss:$16 sps:$4 sm:$0xff]  }
 0x297   :  { %v4750_v48 = vld [vmem:[#allocation7 + $0x3a8] ss:$16 sps:$4 sm:$0xff]  }
 0x298   :  { %1803 = vmatprep.mubr.bf16.mxu1 %v1000_v49  ;;  %1885 = vmatprep.mubr.bf16.mxu0 %v1000_v49  ;;  %v4755_v49 = vld [vmem:[#allocation7 + $0x3c4] ss:$16 sps:$4 sm:$0xff]  }
 0x299   :  { %1804 = vmatmul.mubr.bf16.vlgmr.msra.gmra.mrb[4].mxu1 %v999_v52  ;;  %1886 = vmatmul.mubr.bf16.vlgmr.msra.gmra.mrb[8].mxu0 %v999_v52  ;;  %v4756_v52 = vld [vmem:[#allocation7 + $0x3c8] ss:$16 sps:$4 sm:$0xff]  }
 0x29a   :  { %1813 = vmatpush1.bf16.msra.mxu1 %v4669_v50  ;;  %1895 = vmatpush1.bf16.msra.mxu0 %v4672_v51  ;;  %v4758_v50 = vld [vmem:[#allocation7 + $0x3cc] ss:$16 sps:$4 sm:$0xff]   ;;  %v4753_v51 = vld [vmem:[#allocation7 + $0x3c0] ss:$16 sps:$4 sm:$0xff]  }
 0x29b   :  { %1844 = vmatprep.mubr.bf16.mxu1 %v1002_v55  ;;  %1926 = vmatprep.mubr.bf16.mxu0 %v1002_v55  ;;  %v4759_v55 = vld [vmem:[#allocation7 + $0x3e0] ss:$16 sps:$4 sm:$0xff]  }
 0x29c   :  { %1814 = vmatprep.subr.bf16.mxu1 %v4677_v53  ;;  %1896 = vmatprep.subr.bf16.mxu0 %v4680_v54  ;;  %v4761_v53 = vld [vmem:[#allocation7 + $0x3e4] ss:$16 sps:$4 sm:$0xff]   ;;  %v4764_v54 = vld [vmem:[#allocation7 + $0x3ec] ss:$16 sps:$4 sm:$0xff]  }
 0x29e   :  { %1815 = vmatpush1.bf16.msra.mxu1 %v4675_v56  ;;  %1897 = vmatpush1.bf16.msra.mxu0 %v4678_v57  ;;  %v4762_v56 = vld [vmem:[#allocation7 + $0x3e8] ss:$16 sps:$4 sm:$0xff]   ;;  %v997_v57 = vmax.f32 %v5435_v45, 0.0  ;;  %v4779_v45 = vld [vmem:[#allocation8 + $0x74] ss:$28 sps:$4 sm:$0xff]  }
 0x29f   :  { %1816 = vmatprep.subr.bf16.mxu1 %v4683_v58  ;;  %1898 = vmatprep.subr.bf16.mxu0 %v4686_v59  ;;  %v4767_v59 = vld [vmem:[#allocation8 + $0x4] ss:$28 sps:$4 sm:$0xff]  }
 0x2a0   :  { %v1001_v58 = vpack.c.bf16 %v997_v57, %v997_v57  ;;  %v4851_v57 = vld [vmem:[#allocation8 + $0x314] ss:$28 sps:$4 sm:$0xff]  }
 0x2a2   :  { %1817 = vmatpush1.bf16.msra.mxu1 %v4681_v60  ;;  %1899 = vmatpush1.bf16.msra.mxu0 %v4684_v61  ;;  %v4770_v60 = vld [vmem:[#allocation8 + $0xc] ss:$28 sps:$4 sm:$0xff]   ;;  %v4765_v61 = vld [vmem:[#allocation8] ss:$28 sps:$4 sm:$0xff]  }
 0x2a3   :  { %1818 = vmatprep.subr.bf16.mxu1 %v4689_v62  ;;  %1900 = vmatprep.subr.bf16.mxu0 %v4692_v63  ;;  %v4768_v62 = vld [vmem:[#allocation8 + $0x8] ss:$28 sps:$4 sm:$0xff]   ;;  %v4773_v63 = vld [vmem:[#allocation8 + $0x3c] ss:$28 sps:$4 sm:$0xff]  }
 0x2a6   :  { %1819 = vmatpush1.bf16.msra.mxu1 %v4687_v1  ;;  %1901 = vmatpush1.bf16.msra.mxu0 %v4690_v3  ;;  %v4776_v1 = vld [vmem:[#allocation8 + $0x44] ss:$28 sps:$4 sm:$0xff]   ;;  %v4771_v3 = vld [vmem:[#allocation8 + $0x38] ss:$28 sps:$4 sm:$0xff]  }
 0x2a7   :  { %1820 = vmatprep.subr.bf16.mxu1 %v4695_v4  ;;  %1902 = vmatprep.subr.bf16.mxu0 %v4698_v5  ;;  %v4774_v4 = vld [vmem:[#allocation8 + $0x40] ss:$28 sps:$4 sm:$0xff]  }
 0x2a8   :  { %v4782_v5 = vld [vmem:[#allocation8 + $0x7c] ss:$28 sps:$4 sm:$0xff]  }
 0x2aa   :  { %1821 = vmatpush1.bf16.msra.mxu1 %v4693_v6  ;;  %1903 = vmatpush1.bf16.msra.mxu0 %v4696_v7  ;;  %v4777_v6 = vld [vmem:[#allocation8 + $0x70] ss:$28 sps:$4 sm:$0xff]   ;;  %v4780_v7 = vld [vmem:[#allocation8 + $0x78] ss:$28 sps:$4 sm:$0xff]  }
 0x2ab   :  { %1822 = vmatprep.subr.bf16.mxu1 %v4701_v10  ;;  %1904 = vmatprep.subr.bf16.mxu0 %v4704_v11  ;;  %v4785_v10 = vld [vmem:[#allocation8 + $0xac] ss:$28 sps:$4 sm:$0xff]   ;;  %v4788_v11 = vld [vmem:[#allocation8 + $0xb4] ss:$28 sps:$4 sm:$0xff]  }
 0x2ae   :  { %1823 = vmatpush1.bf16.msra.mxu1 %v4699_v12  ;;  %1905 = vmatpush1.bf16.msra.mxu0 %v4702_v13  ;;  %v4783_v12 = vld [vmem:[#allocation8 + $0xa8] ss:$28 sps:$4 sm:$0xff]   ;;  %v4786_v13 = vld [vmem:[#allocation8 + $0xb0] ss:$28 sps:$4 sm:$0xff]  }
 0x2af   :  { %1824 = vmatprep.subr.bf16.mxu1 %v4707_v14  ;;  %1906 = vmatprep.subr.bf16.mxu0 %v4710_v17  ;;  %v4791_v14 = vld [vmem:[#allocation8 + $0xe4] ss:$28 sps:$4 sm:$0xff]   ;;  %v4794_v17 = vld [vmem:[#allocation8 + $0xec] ss:$28 sps:$4 sm:$0xff]  }
 0x2b2   :  { %1825 = vmatpush1.bf16.msra.mxu1 %v4705_v19  ;;  %1907 = vmatpush1.bf16.msra.mxu0 %v4708_v20  ;;  %v4789_v19 = vld [vmem:[#allocation8 + $0xe0] ss:$28 sps:$4 sm:$0xff]   ;;  %v4792_v20 = vld [vmem:[#allocation8 + $0xe8] ss:$28 sps:$4 sm:$0xff]  }
 0x2b3   :  { %1826 = vmatprep.subr.bf16.mxu1 %v4713_v22  ;;  %1908 = vmatprep.subr.bf16.mxu0 %v4716_v23  ;;  %v4797_v22 = vld [vmem:[#allocation8 + $0x11c] ss:$28 sps:$4 sm:$0xff]   ;;  %v4800_v23 = vld [vmem:[#allocation8 + $0x124] ss:$28 sps:$4 sm:$0xff]  }
 0x2b6   :  { %1827 = vmatpush1.bf16.msra.mxu1 %v4711_v24  ;;  %1909 = vmatpush1.bf16.msra.mxu0 %v4714_v25  ;;  %v4795_v24 = vld [vmem:[#allocation8 + $0x118] ss:$28 sps:$4 sm:$0xff]   ;;  %v4798_v25 = vld [vmem:[#allocation8 + $0x120] ss:$28 sps:$4 sm:$0xff]  }
 0x2b7   :  { %1828 = vmatprep.subr.bf16.mxu1 %v4719_v26  ;;  %1910 = vmatprep.subr.bf16.mxu0 %v4722_v27  ;;  %v4803_v26 = vld [vmem:[#allocation8 + $0x154] ss:$28 sps:$4 sm:$0xff]   ;;  %v4806_v27 = vld [vmem:[#allocation8 + $0x15c] ss:$28 sps:$4 sm:$0xff]  }
 0x2ba   :  { %1829 = vmatpush1.bf16.msra.mxu1 %v4717_v28  ;;  %1911 = vmatpush1.bf16.msra.mxu0 %v4720_v21  ;;  %v4801_v28 = vld [vmem:[#allocation8 + $0x150] ss:$28 sps:$4 sm:$0xff]   ;;  %v4804_v21 = vld [vmem:[#allocation8 + $0x158] ss:$28 sps:$4 sm:$0xff]  }
 0x2bb   :  { %1830 = vmatprep.subr.bf16.mxu1 %v4725_v29  ;;  %1912 = vmatprep.subr.bf16.mxu0 %v4728_v18  ;;  %v4809_v29 = vld [vmem:[#allocation8 + $0x18c] ss:$28 sps:$4 sm:$0xff]   ;;  %v4812_v18 = vld [vmem:[#allocation8 + $0x194] ss:$28 sps:$4 sm:$0xff]  }
 0x2be   :  { %1831 = vmatpush1.bf16.msra.mxu1 %v4723_v30  ;;  %1913 = vmatpush1.bf16.msra.mxu0 %v4726_v31  ;;  %v4807_v30 = vld [vmem:[#allocation8 + $0x188] ss:$28 sps:$4 sm:$0xff]   ;;  %v4810_v31 = vld [vmem:[#allocation8 + $0x190] ss:$28 sps:$4 sm:$0xff]  }
 0x2bf   :  { %1832 = vmatprep.subr.bf16.mxu1 %v4731_v33  ;;  %1914 = vmatprep.subr.bf16.mxu0 %v4734_v35  ;;  %v4815_v33 = vld [vmem:[#allocation8 + $0x1c4] ss:$28 sps:$4 sm:$0xff]   ;;  %v4818_v35 = vld [vmem:[#allocation8 + $0x1cc] ss:$28 sps:$4 sm:$0xff]  }
 0x2c2   :  { %1833 = vmatpush1.bf16.msra.mxu1 %v4729_v39  ;;  %1915 = vmatpush1.bf16.msra.mxu0 %v4732_v34  ;;  %v4813_v39 = vld [vmem:[#allocation8 + $0x1c0] ss:$28 sps:$4 sm:$0xff]   ;;  %v4816_v34 = vld [vmem:[#allocation8 + $0x1c8] ss:$28 sps:$4 sm:$0xff]  }
 0x2c3   :  { %1834 = vmatprep.subr.bf16.mxu1 %v4737_v43  ;;  %1916 = vmatprep.subr.bf16.mxu0 %v4740_v32  ;;  %v4821_v43 = vld [vmem:[#allocation8 + $0x1fc] ss:$28 sps:$4 sm:$0xff]   ;;  %v4824_v32 = vld [vmem:[#allocation8 + $0x204] ss:$28 sps:$4 sm:$0xff]  }
 0x2c6   :  { %1835 = vmatpush1.bf16.msra.mxu1 %v4735_v42  ;;  %1917 = vmatpush1.bf16.msra.mxu0 %v4738_v36  ;;  %v4819_v42 = vld [vmem:[#allocation8 + $0x1f8] ss:$28 sps:$4 sm:$0xff]   ;;  %v4822_v36 = vld [vmem:[#allocation8 + $0x200] ss:$28 sps:$4 sm:$0xff]  }
 0x2c7   :  { %1836 = vmatprep.subr.bf16.mxu1 %v4743_v37  ;;  %1918 = vmatprep.subr.bf16.mxu0 %v4746_v38  ;;  %v4827_v37 = vld [vmem:[#allocation8 + $0x234] ss:$28 sps:$4 sm:$0xff]   ;;  %v4830_v38 = vld [vmem:[#allocation8 + $0x23c] ss:$28 sps:$4 sm:$0xff]  }
 0x2ca   :  { %1837 = vmatpush1.bf16.msra.mxu1 %v4741_v40  ;;  %1919 = vmatpush1.bf16.msra.mxu0 %v4744_v41  ;;  %v4825_v40 = vld [vmem:[#allocation8 + $0x230] ss:$28 sps:$4 sm:$0xff]   ;;  %v4828_v41 = vld [vmem:[#allocation8 + $0x238] ss:$28 sps:$4 sm:$0xff]  }
 0x2cb   :  { %1838 = vmatprep.subr.bf16.mxu1 %v4749_v44  ;;  %1920 = vmatprep.subr.bf16.mxu0 %v4752_v46  ;;  %v4833_v44 = vld [vmem:[#allocation8 + $0x26c] ss:$28 sps:$4 sm:$0xff]   ;;  %v4836_v46 = vld [vmem:[#allocation8 + $0x274] ss:$28 sps:$4 sm:$0xff]  }
 0x2ce   :  { %1839 = vmatpush1.bf16.msra.mxu1 %v4747_v47  ;;  %1921 = vmatpush1.bf16.msra.mxu0 %v4750_v48  ;;  %v4831_v47 = vld [vmem:[#allocation8 + $0x268] ss:$28 sps:$4 sm:$0xff]   ;;  %v4834_v48 = vld [vmem:[#allocation8 + $0x270] ss:$28 sps:$4 sm:$0xff]  }
 0x2cf   :  { %1840 = vmatprep.subr.bf16.mxu1 %v4755_v49  ;;  %1922 = vmatprep.subr.bf16.mxu0 %v4758_v50  ;;  %v4839_v49 = vld [vmem:[#allocation8 + $0x2a4] ss:$28 sps:$4 sm:$0xff]   ;;  %v4842_v50 = vld [vmem:[#allocation8 + $0x2ac] ss:$28 sps:$4 sm:$0xff]  }
 0x2d2   :  { %1841 = vmatpush1.bf16.msra.mxu1 %v4753_v51  ;;  %1923 = vmatpush1.bf16.msra.mxu0 %v4756_v52  ;;  %v4837_v51 = vld [vmem:[#allocation8 + $0x2a0] ss:$28 sps:$4 sm:$0xff]   ;;  %v4840_v52 = vld [vmem:[#allocation8 + $0x2a8] ss:$28 sps:$4 sm:$0xff]  }
 0x2d3   :  { %1842 = vmatprep.subr.bf16.mxu1 %v4761_v53  ;;  %1924 = vmatprep.subr.bf16.mxu0 %v4764_v54  ;;  %v4845_v53 = vld [vmem:[#allocation8 + $0x2dc] ss:$28 sps:$4 sm:$0xff]   ;;  %v4848_v54 = vld [vmem:[#allocation8 + $0x2e4] ss:$28 sps:$4 sm:$0xff]  }
 0x2d6   :  { %1843 = vmatpush1.bf16.msra.mxu1 %v4759_v55  ;;  %1925 = vmatpush1.bf16.msra.mxu0 %v4762_v56  ;;  %v4843_v55 = vld [vmem:[#allocation8 + $0x2d8] ss:$28 sps:$4 sm:$0xff]   ;;  %v4846_v56 = vld [vmem:[#allocation8 + $0x2e0] ss:$28 sps:$4 sm:$0xff]  }
 0x2d7   :  { %3581 = vmatprep.subr.bf16.mxu1 %v4767_v59  ;;  %3663 = vmatprep.subr.bf16.mxu0 %v4770_v60  ;;  %v4849_v59 = vld [vmem:[#allocation8 + $0x310] ss:$28 sps:$4 sm:$0xff]   ;;  %v4852_v60 = vld [vmem:[#allocation8 + $0x318] ss:$28 sps:$4 sm:$0xff]  }
 0x2d9   :  { %1845 = vmatmul.mubr.bf16.vlgmr.msra.gmra.mrb[4].mxu1 %v1001_v58  ;;  %1927 = vmatmul.mubr.bf16.vlgmr.msra.gmra.mrb[8].mxu0 %v1001_v58  ;;  %v4854_v58 = vld [vmem:[#allocation8 + $0x31c] ss:$28 sps:$4 sm:$0xff]  }
 0x2da   :  { %3582 = vmatpush1.bf16.msra.mxu1 %v4765_v61  ;;  %3664 = vmatpush1.bf16.msra.mxu0 %v4768_v62  ;;  %v4855_v61 = vld [vmem:[#allocation8 + $0x348] ss:$28 sps:$4 sm:$0xff]  }
 0x2db   :  { %3583 = vmatprep.subr.bf16.mxu1 %v4773_v63  ;;  %3665 = vmatprep.subr.bf16.mxu0 %v4776_v1  ;;  %v4857_v62 = vld [vmem:[#allocation8 + $0x34c] ss:$28 sps:$4 sm:$0xff]   ;;  %v4860_v1 = vld [vmem:[#allocation8 + $0x354] ss:$28 sps:$4 sm:$0xff]  }
 0x2dc   :  { %v4858_v63 = vld [vmem:[#allocation8 + $0x350] ss:$28 sps:$4 sm:$0xff]  }
 0x2de   :  { %3584 = vmatpush1.bf16.msra.mxu1 %v4771_v3  ;;  %3666 = vmatpush1.bf16.msra.mxu0 %v4774_v4  ;;  %v4863_v3 = vld [vmem:[#allocation8 + $0x384] ss:$28 sps:$4 sm:$0xff]   ;;  %v4866_v4 = vld [vmem:[#allocation8 + $0x38c] ss:$28 sps:$4 sm:$0xff]  }
 0x2df   :  { %3585 = vmatprep.subr.bf16.mxu1 %v4779_v45  ;;  %3667 = vmatprep.subr.bf16.mxu0 %v4782_v5 }
 0x2e2   :  { %3586 = vmatpush1.bf16.msra.mxu1 %v4777_v6  ;;  %3668 = vmatpush1.bf16.msra.mxu0 %v4780_v7 }
 0x2e3   :  { %3587 = vmatprep.subr.bf16.mxu1 %v4785_v10  ;;  %3669 = vmatprep.subr.bf16.mxu0 %v4788_v11 }
 0x2e6   :  { %3588 = vmatpush1.bf16.msra.mxu1 %v4783_v12  ;;  %3670 = vmatpush1.bf16.msra.mxu0 %v4786_v13 }
 0x2e7   :  { %3589 = vmatprep.subr.bf16.mxu1 %v4791_v14  ;;  %3671 = vmatprep.subr.bf16.mxu0 %v4794_v17 }
 0x2ea   :  { %3590 = vmatpush1.bf16.msra.mxu1 %v4789_v19  ;;  %3672 = vmatpush1.bf16.msra.mxu0 %v4792_v20 }
 0x2eb   :  { %3591 = vmatprep.subr.bf16.mxu1 %v4797_v22  ;;  %3673 = vmatprep.subr.bf16.mxu0 %v4800_v23 }
 0x2ee   :  { %3592 = vmatpush1.bf16.msra.mxu1 %v4795_v24  ;;  %3674 = vmatpush1.bf16.msra.mxu0 %v4798_v25 }
 0x2ef   :  { %3593 = vmatprep.subr.bf16.mxu1 %v4803_v26  ;;  %3675 = vmatprep.subr.bf16.mxu0 %v4806_v27 }
 0x2f2   :  { %3594 = vmatpush1.bf16.msra.mxu1 %v4801_v28  ;;  %3676 = vmatpush1.bf16.msra.mxu0 %v4804_v21 }
 0x2f3   :  { %3595 = vmatprep.subr.bf16.mxu1 %v4809_v29  ;;  %3677 = vmatprep.subr.bf16.mxu0 %v4812_v18 }
 0x2f6   :  { %3596 = vmatpush1.bf16.msra.mxu1 %v4807_v30  ;;  %3678 = vmatpush1.bf16.msra.mxu0 %v4810_v31 }
 0x2f7   :  { %3597 = vmatprep.subr.bf16.mxu1 %v4815_v33  ;;  %3679 = vmatprep.subr.bf16.mxu0 %v4818_v35 }
 0x2fa   :  { %3598 = vmatpush1.bf16.msra.mxu1 %v4813_v39  ;;  %3680 = vmatpush1.bf16.msra.mxu0 %v4816_v34 }
 0x2fb   :  { %3599 = vmatprep.subr.bf16.mxu1 %v4821_v43  ;;  %3681 = vmatprep.subr.bf16.mxu0 %v4824_v32 }
 0x2fe   :  { %3600 = vmatpush1.bf16.msra.mxu1 %v4819_v42  ;;  %3682 = vmatpush1.bf16.msra.mxu0 %v4822_v36 }
 0x2ff   :  { %3601 = vmatprep.subr.bf16.mxu1 %v4827_v37  ;;  %3683 = vmatprep.subr.bf16.mxu0 %v4830_v38 }
 0x302   :  { %3602 = vmatpush1.bf16.msra.mxu1 %v4825_v40  ;;  %3684 = vmatpush1.bf16.msra.mxu0 %v4828_v41 }
 0x303   :  { %3603 = vmatprep.subr.bf16.mxu1 %v4833_v44  ;;  %3685 = vmatprep.subr.bf16.mxu0 %v4836_v46 }
 0x306   :  { %3604 = vmatpush1.bf16.msra.mxu1 %v4831_v47  ;;  %3686 = vmatpush1.bf16.msra.mxu0 %v4834_v48 }
 0x307   :  { %3605 = vmatprep.subr.bf16.mxu1 %v4839_v49  ;;  %3687 = vmatprep.subr.bf16.mxu0 %v4842_v50 }
 0x30a   :  { %3606 = vmatpush1.bf16.msra.mxu1 %v4837_v51  ;;  %3688 = vmatpush1.bf16.msra.mxu0 %v4840_v52 }
 0x30b   :  { %3607 = vmatprep.subr.bf16.mxu1 %v4845_v53  ;;  %3689 = vmatprep.subr.bf16.mxu0 %v4848_v54 }
 0x30e   :  { %3608 = vmatpush1.bf16.msra.mxu1 %v4843_v55  ;;  %3690 = vmatpush1.bf16.msra.mxu0 %v4846_v56 }
 0x30f   :  { %3609 = vmatprep.subr.bf16.mxu1 %v4851_v57  ;;  %3691 = vmatprep.subr.bf16.mxu0 %v4854_v58 }
 0x312   :  { %3610 = vmatpush1.bf16.msra.mxu1 %v4849_v59  ;;  %3692 = vmatpush1.bf16.msra.mxu0 %v4852_v60 }
 0x313   :  { %3611 = vmatprep.subr.bf16.mxu1 %v4857_v62  ;;  %3693 = vmatprep.subr.bf16.mxu0 %v4860_v1 }
 0x316   :  { %3612 = vmatpush1.bf16.msra.mxu1 %v4855_v61  ;;  %3694 = vmatpush1.bf16.msra.mxu0 %v4858_v63 }
 0x317   :  { %3622 = vmatprep.subr.bf16.mxu1 %v4863_v3  ;;  %3704 = vmatprep.subr.bf16.mxu0 %v4866_v4 }
 0x3ac   :  { %v5438_v45 = vpop.f32.mrb[4].mxu1  ;;  %v5440_v5 = vpop.f32.mrb[8].mxu0 }
 0x3ad   :  { %v1935_v6 = vrot.slane %v5438_v45, 4  ;;  %v1963_v7 = vmul.f32 %v5438_v45, %v5438_v45  ;;  %v1947_v10 = vrot.slane %v5440_v5, 4  ;;  %v1965_v11 = vmul.f32 %v5440_v5, %v5440_v5  ;;  %v5448_v12 = vpop.f32.mrb[5].mxu1  ;;  %v5450_v13 = vpop.f32.mrb[9].mxu0 }
 0x3ae   :  { %v1941_v14 = vrot.slane %v5448_v12, 4  ;;  %v1964_v17 = vmul.f32 %v5448_v12, %v5448_v12  ;;  %v1953_v19 = vrot.slane %v5450_v13, 4  ;;  %v1966_v20 = vmul.f32 %v5450_v13, %v5450_v13  ;;  %v1850_v22 = vpop.f32.mrb[6].mxu1  ;;  %v1932_v23 = vpop.f32.mrb[10].mxu0 }
 0x3af   :  { %v1936_v24 = vadd.f32 %v1935_v6, %v5438_v45  ;;  %v1967_v25 = vrot.slane %v1963_v7, 4  ;;  %v1948_v26 = vadd.f32 %v1947_v10, %v5440_v5  ;;  %v1979_v27 = vrot.slane %v1965_v11, 4  ;;  %v1851_v28 = vpop.f32.mrb[7].mxu1  ;;  %v1933_v21 = vpop.f32.mrb[11].mxu0 }
 0x3b0   :  { %v1942_v29 = vadd.f32 %v1941_v14, %v5448_v12  ;;  %v1973_v18 = vrot.slane %v1964_v17, 4  ;;  %v1954_v30 = vadd.f32 %v1953_v19, %v5450_v13  ;;  %v1985_v31 = vrot.slane %v1966_v20, 4 }
 0x3b1   :  { %v1937_v33 = vrot.slane %v1936_v24, 2  ;;  %v1968_v35 = vadd.f32 %v1967_v25, %v1963_v7  ;;  %v1949_v39 = vrot.slane %v1948_v26, 2  ;;  %v1980_v34 = vadd.f32 %v1979_v27, %v1965_v11 }
 0x3b2   :  { %v1943_v43 = vrot.slane %v1942_v29, 2  ;;  %v1974_v32 = vadd.f32 %v1973_v18, %v1964_v17  ;;  %v1955_v42 = vrot.slane %v1954_v30, 2  ;;  %v1986_v36 = vadd.f32 %v1985_v31, %v1966_v20 }
 0x3b3   :  { %v1938_v37 = vadd.f32 %v1937_v33, %v1936_v24  ;;  %v1969_v38 = vrot.slane %v1968_v35, 2  ;;  %v1950_v40 = vadd.f32 %v1949_v39, %v1948_v26  ;;  %v1981_v41 = vrot.slane %v1980_v34, 2 }
 0x3b4   :  { %v1944_v44 = vadd.f32 %v1943_v43, %v1942_v29  ;;  %v1975_v46 = vrot.slane %v1974_v32, 2  ;;  %v1956_v47 = vadd.f32 %v1955_v42, %v1954_v30  ;;  %v1987_v48 = vrot.slane %v1986_v36, 2 }
 0x3b5   :  { %v1939_v49 = vrot.slane %v1938_v37, 1  ;;  %v1970_v50 = vadd.f32 %v1969_v38, %v1968_v35  ;;  %v1951_v51 = vrot.slane %v1950_v40, 1  ;;  %v1982_v52 = vadd.f32 %v1981_v41, %v1980_v34 }
 0x3b6   :  { %v1945_v53 = vrot.slane %v1944_v44, 1  ;;  %v1976_v54 = vadd.f32 %v1975_v46, %v1974_v32  ;;  %v1957_v55 = vrot.slane %v1956_v47, 1  ;;  %v1988_v56 = vadd.f32 %v1987_v48, %v1986_v36  ;;  %v84_v48 = vld [vmem:[%s5540_s5 + $0xc] sm:$0xf] }
 0x3b7   :  { %v1940_v57 = vadd.f32 %v1939_v49, %v1938_v37  ;;  %v1971_v58 = vrot.slane %v1970_v50, 1  ;;  %v1952_v59 = vadd.f32 %v1951_v51, %v1950_v40  ;;  %v1983_v60 = vrot.slane %v1982_v52, 1 }
 0x3b8   :  { %v1946_v61 = vadd.f32 %v1945_v53, %v1944_v44  ;;  %v1977_v62 = vrot.slane %v1976_v54, 1  ;;  %v1958_v63 = vadd.f32 %v1957_v55, %v1956_v47  ;;  %v1989_v1 = vrot.slane %v1988_v56, 1 }
 0x3b9   :  { %v1959_v3 = vmul.f32 0.125, %v1940_v57  ;;  %v1972_v4 = vadd.f32 %v1971_v58, %v1970_v50  ;;  %v1961_v6 = vmul.f32 0.125, %v1952_v59  ;;  %v1984_v7 = vadd.f32 %v1983_v60, %v1982_v52 }
 0x3ba   :  { %v1960_v10 = vmul.f32 0.125, %v1946_v61  ;;  %v1978_v11 = vadd.f32 %v1977_v62, %v1976_v54  ;;  %v1962_v14 = vmul.f32 0.125, %v1958_v63  ;;  %v1990_v17 = vadd.f32 %v1989_v1, %v1988_v56 }
 0x3bb   :  { %v1991_v19 = vmul.f32 0.125, %v1972_v4  ;;  %v1995_v20 = vmul.f32 %v1959_v3, %v1959_v3  ;;  %v1993_v22 = vmul.f32 0.125, %v1984_v7  ;;  %v1997_v23 = vmul.f32 %v1961_v6, %v1961_v6 }
 0x3bc   :  { %v1992_v24 = vmul.f32 0.125, %v1978_v11  ;;  %v1996_v25 = vmul.f32 %v1960_v10, %v1960_v10  ;;  %v1994_v26 = vmul.f32 0.125, %v1990_v17  ;;  %v1998_v27 = vmul.f32 %v1962_v14, %v1962_v14 }
 0x3bd   :  { %v1999_v28 = vsub.f32 %v1991_v19, %v1995_v20  ;;  %v2001_v21 = vsub.f32 %v1993_v22, %v1997_v23 }
 0x3be   :  { %v2000_v29 = vsub.f32 %v1992_v24, %v1996_v25  ;;  %v2002_v18 = vsub.f32 %v1994_v26, %v1998_v27  ;;  %v4864_v26 = vld [vmem:[#allocation8 + $0x388] ss:$28 sps:$4 sm:$0xff]  }
 0x3bf   :  { %v2003_v30 = vmax.f32 %v1999_v28, 0.0  ;;  %v2005_v31 = vmax.f32 %v2001_v21, 0.0  ;;  %v4869_v28 = vld [vmem:[#allocation8 + $0x3bc] ss:$28 sps:$4 sm:$0xff]   ;;  %v4872_v21 = vld [vmem:[#allocation8 + $0x3c4] ss:$28 sps:$4 sm:$0xff]  }
 0x3c0   :  { %v2004_v33 = vmax.f32 %v2000_v29, 0.0  ;;  %v2006_v35 = vmax.f32 %v2002_v18, 0.0  ;;  %v4867_v18 = vld [vmem:[#allocation8 + $0x3b8] ss:$28 sps:$4 sm:$0xff]  }
 0x3c1   :  { %v2007_v39 = vadd.f32 1e-05, %v2003_v30  ;;  %v2009_v34 = vadd.f32 1e-05, %v2005_v31  ;;  %v4870_v30 = vld [vmem:[#allocation8 + $0x3c0] ss:$28 sps:$4 sm:$0xff]  }
 0x3c2   :  { %v2008_v43 = vadd.f32 1e-05, %v2004_v33  ;;  %v2010_v32 = vadd.f32 1e-05, %v2006_v35  ;;  %v4875_v31 = vld [vmem:[#allocation8 + $0x3f4] ss:$28 sps:$4 sm:$0xff]  }
 0x3c3   :  { %5097 = vrsqrt.f32 %v2007_v39  ;;  %v4878_v33 = vld [vmem:[#allocation8 + $0x3fc] ss:$28 sps:$4 sm:$0xff]   ;;  %v4873_v35 = vld [vmem:[#allocation8 + $0x3f0] ss:$28 sps:$4 sm:$0xff]  }
 0x3c4   :  { %5099 = vrsqrt.f32 %v2009_v34  ;;  %v4876_v39 = vld [vmem:[#allocation8 + $0x3f8] ss:$28 sps:$4 sm:$0xff]   ;;  %v4881_v34 = vld [vmem:[#allocation8 + $0x42c] ss:$28 sps:$4 sm:$0xff]  }
 0x3c5   :  { %5101 = vrsqrt.f32 %v2008_v43  ;;  %v4884_v43 = vld [vmem:[#allocation8 + $0x434] ss:$28 sps:$4 sm:$0xff]  }
 0x3c6   :  { %5103 = vrsqrt.f32 %v2010_v32  ;;  %v4879_v32 = vld [vmem:[#allocation8 + $0x428] ss:$28 sps:$4 sm:$0xff]  }
 0x3cd   :  { %v5098_v42 = vpop.eup %5097 }
 0x3ce   :  { %v5100_v36 = vpop.eup %5099 }
 0x3cf   :  { %v5102_v37 = vpop.eup %5101 }
 0x3d0   :  { %v5104_v38 = vpop.eup %5103  ;;  %v2019_v40 = vcombine.low %v5098_v42, %v5102_v37  ;;  %v4882_v42 = vld [vmem:[#allocation8 + $0x430] ss:$28 sps:$4 sm:$0xff]  }
 0x3d1   :  { %v2020_v41 = vcombine.low %v5100_v36, %v5104_v38  ;;  %v4887_v36 = vld [vmem:[#allocation8 + $0x464] ss:$28 sps:$4 sm:$0xff]   ;;  %v4890_v37 = vld [vmem:[#allocation8 + $0x46c] ss:$28 sps:$4 sm:$0xff]  }
 0x3d2   :  { %v2027_v44 = vrot.slane %v2019_v40, %v5358_v2  ;;  %v4885_v38 = vld [vmem:[#allocation8 + $0x460] ss:$28 sps:$4 sm:$0xff]   ;;  %v4888_v40 = vld [vmem:[#allocation8 + $0x468] ss:$28 sps:$4 sm:$0xff]  }
 0x3d3   :  { %v2034_v46 = vrot.slane %v2020_v41, %v5358_v2  ;;  %v4893_v41 = vld [vmem:[#allocation8 + $0x49c] ss:$28 sps:$4 sm:$0xff]  }
 0x3d5   :  { %v2035_v47 = vcombine.low %v2027_v44, %v2034_v46  ;;  %v4896_v44 = vld [vmem:[#allocation8 + $0x4a4] ss:$28 sps:$4 sm:$0xff]   ;;  %v4891_v46 = vld [vmem:[#allocation8 + $0x498] ss:$28 sps:$4 sm:$0xff]  }
 0x3d7   :  { %v2042_v49 = vrot.slane %v2035_v47, %v5358_v2  ;;  %v4894_v47 = vld [vmem:[#allocation8 + $0x4a0] ss:$28 sps:$4 sm:$0xff]  }
 0x3d9   :  { %v2044_v50 = vmul.f32 %v2042_v49, %v84_v48  ;;  %v4899_v48 = vld [vmem:[#allocation8 + $0x4d4] ss:$28 sps:$4 sm:$0xff]   ;;  %v4902_v49 = vld [vmem:[#allocation8 + $0x4dc] ss:$28 sps:$4 sm:$0xff]  }
 0x3db   :  { %v2049_v51 = vrot.slane %v2044_v50, %v5366_v8  ;;  %v2053_v52 = vrot.slane %v2044_v50, %v5369_v9  ;;  %v2057_v53 = vrot.slane %v2044_v50, %v5412_v15  ;;  %v2061_v54 = vrot.slane %v2044_v50, %v5415_v16  ;;  %v4897_v50 = vld [vmem:[#allocation8 + $0x4d0] ss:$28 sps:$4 sm:$0xff]  }
 0x3dd   :  { %v2066_v55 = vmul.f32 %v2049_v51, %v1959_v3  ;;  %v2067_v56 = vmul.f32 %v2053_v52, %v1960_v10  ;;  %v2068_v57 = vmul.f32 %v2057_v53, %v1961_v6  ;;  %v2069_v58 = vmul.f32 %v2061_v54, %v1962_v14  ;;  %v85_v3 = vld [vmem:[%s5540_s5 + $0x10] sm:$0xf] }
 0x3de   :  { %v2103_v59 = vmul.f32 %v2061_v54, %v5450_v13  ;;  %v2101_v60 = vmul.f32 %v2053_v52, %v5448_v12  ;;  %v2100_v61 = vmul.f32 %v2049_v51, %v5438_v45  ;;  %v2102_v62 = vmul.f32 %v2057_v53, %v5440_v5  ;;  %v4900_v51 = vld [vmem:[#allocation8 + $0x4d8] ss:$28 sps:$4 sm:$0xff]   ;;  %v4905_v52 = vld [vmem:[#allocation8 + $0x50c] ss:$28 sps:$4 sm:$0xff]  }
 0x3df   :  { %v2074_v63 = vcombine.low %v2066_v55, %v2067_v56  ;;  %v2075_v1 = vcombine.low %v2068_v57, %v2069_v58  ;;  %v4908_v53 = vld [vmem:[#allocation8 + $0x514] ss:$28 sps:$4 sm:$0xff]   ;;  %v4903_v54 = vld [vmem:[#allocation8 + $0x508] ss:$28 sps:$4 sm:$0xff]   ;;  %v4909_v58 = vld [vmem:[#allocation8 + $0x540] ss:$28 sps:$4 sm:$0xff]  }
 0x3e0   :  { %v4906_v55 = vld [vmem:[#allocation8 + $0x510] ss:$28 sps:$4 sm:$0xff]   ;;  %v4911_v56 = vld [vmem:[#allocation8 + $0x544] ss:$28 sps:$4 sm:$0xff]  }
 0x3e1   :  { %v2082_v4 = vrot.slane %v2074_v63, %v5358_v2  ;;  %v2089_v7 = vrot.slane %v2075_v1, %v5358_v2  ;;  %v4914_v57 = vld [vmem:[#allocation8 + $0x54c] ss:$28 sps:$4 sm:$0xff]   ;;  %v4918_v63 = vld [vmem:[#allocation8 + $0x580] ss:$28 sps:$4 sm:$0xff]   ;;  %v4923_v1 = vld [vmem:[#allocation8 + $0x5b4] ss:$28 sps:$4 sm:$0xff]  }
 0x3e3   :  { %v2090_v11 = vcombine.low %v2082_v4, %v2089_v7  ;;  %v4926_v4 = vld [vmem:[#allocation8 + $0x5bc] ss:$28 sps:$4 sm:$0xff]   ;;  %v4921_v7 = vld [vmem:[#allocation8 + $0x5b0] ss:$28 sps:$4 sm:$0xff]  }
 0x3e5   :  { %v2097_v6 = vrot.slane %v2090_v11, %v5358_v2  ;;  %v4861_v2 = vld [vmem:[#allocation8 + $0x380] ss:$28 sps:$4 sm:$0xff]   ;;  %v4924_v11 = vld [vmem:[#allocation8 + $0x5b8] ss:$28 sps:$4 sm:$0xff]  }
 0x3e7   :  { %v2099_v13 = vsub.f32 %v85_v3, %v2097_v6  ;;  %v4929_v3 = vld [vmem:[#allocation8 + $0x5ec] ss:$28 sps:$4 sm:$0xff]   ;;  %v4932_v6 = vld [vmem:[#allocation8 + $0x5f4] ss:$28 sps:$4 sm:$0xff]  }
 0x3e9   :  { %v2120_v12 = vrot.slane %v2099_v13, %v5415_v16  ;;  %v2112_v45 = vrot.slane %v2099_v13, %v5369_v9  ;;  %v2108_v5 = vrot.slane %v2099_v13, %v5366_v8  ;;  %v2116_v10 = vrot.slane %v2099_v13, %v5412_v15  ;;  %v4927_v13 = vld [vmem:[#allocation8 + $0x5e8] ss:$28 sps:$4 sm:$0xff]  }
 0x3eb   :  { %v2128_v14 = vadd.f32 %v2120_v12, %v2103_v59  ;;  %v2126_v17 = vadd.f32 %v2112_v45, %v2101_v60  ;;  %v2125_v19 = vadd.f32 %v2108_v5, %v2100_v61  ;;  %v5486_v20 = vadd.f32 %v2116_v10, %v2102_v62  ;;  %v4912_v59 = vld [vmem:[#allocation8 + $0x548] ss:$28 sps:$4 sm:$0xff]   ;;  %v4917_v60 = vld [vmem:[#allocation8 + $0x57c] ss:$28 sps:$4 sm:$0xff]   ;;  %v4930_v12 = vld [vmem:[#allocation8 + $0x5f0] ss:$28 sps:$4 sm:$0xff]  }
 0x3ec   :  { %v4920_v61 = vld [vmem:[#allocation8 + $0x584] ss:$28 sps:$4 sm:$0xff]   ;;  %v4915_v62 = vld [vmem:[#allocation8 + $0x578] ss:$28 sps:$4 sm:$0xff]   ;;  %v4938_v5 = vld [vmem:[#allocation8 + $0x62c] ss:$28 sps:$4 sm:$0xff]  }
 0x3ed   :  { %v2130_v22 = vmax.f32 %v2126_v17, 0.0  ;;  %v2129_v23 = vmax.f32 %v2125_v19, 0.0  ;;  %v2132_v24 = vmax.f32 %v2128_v14, 0.0  ;;  %v4935_v45 = vld [vmem:[#allocation8 + $0x624] ss:$28 sps:$4 sm:$0xff]  }
 0x3ee   :  { %v4933_v10 = vld [vmem:[#allocation8 + $0x620] ss:$28 sps:$4 sm:$0xff]   ;;  %v4936_v14 = vld [vmem:[#allocation8 + $0x628] ss:$28 sps:$4 sm:$0xff]  }
 0x3ef   :  { %v5488_v25 = vpack.c.bf16 %v2130_v22, %v2130_v22  ;;  %v5490_v27 = vpack.c.bf16 %v2129_v23, %v2129_v23  ;;  %v5496_v29 = vpack.c.bf16 %v2132_v24, %v2132_v24  ;;  %v4941_v17 = vld [vmem:[#allocation8 + $0x65c] ss:$28 sps:$4 sm:$0xff]   ;;  %v4944_v19 = vld [vmem:[#allocation8 + $0x664] ss:$28 sps:$4 sm:$0xff]   ;;  %v4947_v24 = vld [vmem:[#allocation8 + $0x694] ss:$28 sps:$4 sm:$0xff]  }
 0x3f0   :  { %v4939_v22 = vld [vmem:[#allocation8 + $0x658] ss:$28 sps:$4 sm:$0xff]   ;;  %v4942_v23 = vld [vmem:[#allocation8 + $0x660] ss:$28 sps:$4 sm:$0xff]  }
 0x3f1   :  { %3613 = vmatprep.mubr.bf16.mxu1 %v5488_v25  ;;  %3695 = vmatprep.mubr.bf16.mxu0 %v5488_v25 }
 0x3f2   :  { %3614 = vmatmul.mubr.bf16.vlgmr.msra.gmra.mrb[8].mxu1 %v5490_v27  ;;  %3696 = vmatmul.mubr.bf16.vlgmr.msra.gmra.mrb[12].mxu0 %v5490_v27 }
 0x3f3   :  { %3623 = vmatpush1.bf16.msra.mxu1 %v4861_v2  ;;  %3705 = vmatpush1.bf16.msra.mxu0 %v4864_v26  ;;  %v4950_v2 = vld [vmem:[#allocation8 + $0x69c] ss:$28 sps:$4 sm:$0xff]   ;;  %v4945_v26 = vld [vmem:[#allocation8 + $0x690] ss:$28 sps:$4 sm:$0xff]  }
 0x3f4   :  { %3654 = vmatprep.mubr.bf16.mxu1 %v5496_v29  ;;  %3736 = vmatprep.mubr.bf16.mxu0 %v5496_v29 }
 0x3f5   :  { %3624 = vmatprep.subr.bf16.mxu1 %v4869_v28  ;;  %3706 = vmatprep.subr.bf16.mxu0 %v4872_v21  ;;  %v4948_v28 = vld [vmem:[#allocation8 + $0x698] ss:$28 sps:$4 sm:$0xff]   ;;  %v4953_v21 = vld [vmem:[#allocation8 + $0x6cc] ss:$28 sps:$4 sm:$0xff]  }
 0x3f7   :  { %3625 = vmatpush1.bf16.msra.mxu1 %v4867_v18  ;;  %3707 = vmatpush1.bf16.msra.mxu0 %v4870_v30  ;;  %v4956_v18 = vld [vmem:[#allocation8 + $0x6d4] ss:$28 sps:$4 sm:$0xff]   ;;  %v4951_v30 = vld [vmem:[#allocation8 + $0x6c8] ss:$28 sps:$4 sm:$0xff]  }
 0x3f8   :  { %3626 = vmatprep.subr.bf16.mxu1 %v4875_v31  ;;  %3708 = vmatprep.subr.bf16.mxu0 %v4878_v33  ;;  %v4954_v31 = vld [vmem:[#allocation8 + $0x6d0] ss:$28 sps:$4 sm:$0xff]   ;;  %v2131_v33 = vmax.f32 %v5486_v20, 0.0  ;;  %v4962_v20 = vld [vmem:[#allocation8 + $0x48] ss:$28 sps:$4 sm:$0xff]  }
 0x3fb   :  { %3627 = vmatpush1.bf16.msra.mxu1 %v4873_v35  ;;  %3709 = vmatpush1.bf16.msra.mxu0 %v4876_v39  ;;  %v4959_v35 = vld [vmem:[#allocation8 + $0x14] ss:$28 sps:$4 sm:$0xff]  }
 0x3fc   :  { %3628 = vmatprep.subr.bf16.mxu1 %v4881_v34  ;;  %3710 = vmatprep.subr.bf16.mxu0 %v4884_v43  ;;  %v4960_v39 = vld [vmem:[#allocation8 + $0x1d8] ss:$28 sps:$4 sm:$0xff]   ;;  %v4957_v34 = vld [vmem:[#allocation8 + $0x10] ss:$28 sps:$4 sm:$0xff]   ;;  %v5501_v43 = vpack.c.bf16 %v2131_v33, %v2131_v33 }
 0x3fd   :  { %v5026_v33 = vld [vmem:[#allocation8 + $0x4b0] ss:$28 sps:$4 sm:$0xff]  }
 0x3ff   :  { %3629 = vmatpush1.bf16.msra.mxu1 %v4879_v32  ;;  %3711 = vmatpush1.bf16.msra.mxu0 %v4882_v42  ;;  %v4961_v32 = vld [vmem:[#allocation8 + $0x18] ss:$28 sps:$4 sm:$0xff]   ;;  %v4964_v42 = vld [vmem:[#allocation8 + $0x4c] ss:$28 sps:$4 sm:$0xff]  }
 0x400   :  { %3630 = vmatprep.subr.bf16.mxu1 %v4887_v36  ;;  %3712 = vmatprep.subr.bf16.mxu0 %v4890_v37  ;;  %v4965_v36 = vld [vmem:[#allocation8 + $0x210] ss:$28 sps:$4 sm:$0xff]  }
 0x401   :  { %v4966_v37 = vld [vmem:[#allocation8 + $0x50] ss:$28 sps:$4 sm:$0xff]  }
 0x403   :  { %3631 = vmatpush1.bf16.msra.mxu1 %v4885_v38  ;;  %3713 = vmatpush1.bf16.msra.mxu0 %v4888_v40  ;;  %v4969_v38 = vld [vmem:[#allocation8 + $0x84] ss:$28 sps:$4 sm:$0xff]  }
 0x404   :  { %3632 = vmatprep.subr.bf16.mxu1 %v4893_v41  ;;  %3714 = vmatprep.subr.bf16.mxu0 %v4896_v44  ;;  %v4970_v40 = vld [vmem:[#allocation8 + $0x248] ss:$28 sps:$4 sm:$0xff]   ;;  %v4967_v41 = vld [vmem:[#allocation8 + $0x80] ss:$28 sps:$4 sm:$0xff]  }
 0x405   :  { %v4971_v44 = vld [vmem:[#allocation8 + $0x88] ss:$28 sps:$4 sm:$0xff]  }
 0x407   :  { %3633 = vmatpush1.bf16.msra.mxu1 %v4891_v46  ;;  %3715 = vmatpush1.bf16.msra.mxu0 %v4894_v47  ;;  %v4974_v46 = vld [vmem:[#allocation8 + $0xbc] ss:$28 sps:$4 sm:$0xff]  }
 0x408   :  { %3634 = vmatprep.subr.bf16.mxu1 %v4899_v48  ;;  %3716 = vmatprep.subr.bf16.mxu0 %v4902_v49  ;;  %v4975_v47 = vld [vmem:[#allocation8 + $0x280] ss:$28 sps:$4 sm:$0xff]   ;;  %v4972_v48 = vld [vmem:[#allocation8 + $0xb8] ss:$28 sps:$4 sm:$0xff]  }
 0x409   :  { %v4976_v49 = vld [vmem:[#allocation8 + $0xc0] ss:$28 sps:$4 sm:$0xff]  }
 0x40b   :  { %3635 = vmatpush1.bf16.msra.mxu1 %v4897_v50  ;;  %3717 = vmatpush1.bf16.msra.mxu0 %v4900_v51  ;;  %v4979_v50 = vld [vmem:[#allocation8 + $0xf4] ss:$28 sps:$4 sm:$0xff]  }
 0x40c   :  { %3636 = vmatprep.subr.bf16.mxu1 %v4905_v52  ;;  %3718 = vmatprep.subr.bf16.mxu0 %v4908_v53  ;;  %v4977_v51 = vld [vmem:[#allocation8 + $0xf0] ss:$28 sps:$4 sm:$0xff]   ;;  %v4981_v52 = vld [vmem:[#allocation8 + $0xf8] ss:$28 sps:$4 sm:$0xff]  }
 0x40d   :  { %v4984_v53 = vld [vmem:[#allocation8 + $0x12c] ss:$28 sps:$4 sm:$0xff]  }
 0x40f   :  { %3637 = vmatpush1.bf16.msra.mxu1 %v4903_v54  ;;  %3719 = vmatpush1.bf16.msra.mxu0 %v4906_v55  ;;  %v4985_v54 = vld [vmem:[#allocation8 + $0x2f0] ss:$28 sps:$4 sm:$0xff]   ;;  %v4982_v55 = vld [vmem:[#allocation8 + $0x128] ss:$28 sps:$4 sm:$0xff]  }
 0x410   :  { %3638 = vmatprep.subr.bf16.mxu1 %v4911_v56  ;;  %3720 = vmatprep.subr.bf16.mxu0 %v4914_v57  ;;  %v4986_v56 = vld [vmem:[#allocation8 + $0x130] ss:$28 sps:$4 sm:$0xff]   ;;  %v4989_v57 = vld [vmem:[#allocation8 + $0x164] ss:$28 sps:$4 sm:$0xff]  }
 0x413   :  { %3639 = vmatpush1.bf16.msra.mxu1 %v4909_v58  ;;  %3721 = vmatpush1.bf16.msra.mxu0 %v4912_v59  ;;  %v4990_v58 = vld [vmem:[#allocation8 + $0x328] ss:$28 sps:$4 sm:$0xff]   ;;  %v4987_v59 = vld [vmem:[#allocation8 + $0x160] ss:$28 sps:$4 sm:$0xff]  }
 0x414   :  { %3640 = vmatprep.subr.bf16.mxu1 %v4917_v60  ;;  %3722 = vmatprep.subr.bf16.mxu0 %v4920_v61  ;;  %v4991_v60 = vld [vmem:[#allocation8 + $0x168] ss:$28 sps:$4 sm:$0xff]   ;;  %v4994_v61 = vld [vmem:[#allocation8 + $0x19c] ss:$28 sps:$4 sm:$0xff]  }
 0x417   :  { %3641 = vmatpush1.bf16.msra.mxu1 %v4915_v62  ;;  %3723 = vmatpush1.bf16.msra.mxu0 %v4918_v63  ;;  %v4995_v62 = vld [vmem:[#allocation8 + $0x360] ss:$28 sps:$4 sm:$0xff]   ;;  %v4992_v63 = vld [vmem:[#allocation8 + $0x198] ss:$28 sps:$4 sm:$0xff]  }
 0x418   :  { %3642 = vmatprep.subr.bf16.mxu1 %v4923_v1  ;;  %3724 = vmatprep.subr.bf16.mxu0 %v4926_v4  ;;  %v4996_v1 = vld [vmem:[#allocation8 + $0x1a0] ss:$28 sps:$4 sm:$0xff]   ;;  %v4999_v4 = vld [vmem:[#allocation8 + $0x1d4] ss:$28 sps:$4 sm:$0xff]  }
 0x41b   :  { %3643 = vmatpush1.bf16.msra.mxu1 %v4921_v7  ;;  %3725 = vmatpush1.bf16.msra.mxu0 %v4924_v11  ;;  %v5000_v7 = vld [vmem:[#allocation8 + $0x558] ss:$28 sps:$4 sm:$0xff]   ;;  %v4997_v11 = vld [vmem:[#allocation8 + $0x1d0] ss:$28 sps:$4 sm:$0xff]  }
 0x41c   :  { %3644 = vmatprep.subr.bf16.mxu1 %v4929_v3  ;;  %3726 = vmatprep.subr.bf16.mxu0 %v4932_v6  ;;  %v5001_v3 = vld [vmem:[#allocation8 + $0x398] ss:$28 sps:$4 sm:$0xff]   ;;  %v5004_v6 = vld [vmem:[#allocation8 + $0x20c] ss:$28 sps:$4 sm:$0xff]  }
 0x41f   :  { %3645 = vmatpush1.bf16.msra.mxu1 %v4927_v13  ;;  %3727 = vmatpush1.bf16.msra.mxu0 %v4930_v12  ;;  %v5005_v13 = vld [vmem:[#allocation8 + $0x590] ss:$28 sps:$4 sm:$0xff]   ;;  %v5002_v12 = vld [vmem:[#allocation8 + $0x208] ss:$28 sps:$4 sm:$0xff]  }
 0x420   :  { %3646 = vmatprep.subr.bf16.mxu1 %v4935_v45  ;;  %3728 = vmatprep.subr.bf16.mxu0 %v4938_v5  ;;  %v5006_v45 = vld [vmem:[#allocation8 + $0x3d0] ss:$28 sps:$4 sm:$0xff]   ;;  %v5009_v5 = vld [vmem:[#allocation8 + $0x244] ss:$28 sps:$4 sm:$0xff]  }
 0x423   :  { %3647 = vmatpush1.bf16.msra.mxu1 %v4933_v10  ;;  %3729 = vmatpush1.bf16.msra.mxu0 %v4936_v14  ;;  %v5010_v10 = vld [vmem:[#allocation8 + $0x5c8] ss:$28 sps:$4 sm:$0xff]   ;;  %v5007_v14 = vld [vmem:[#allocation8 + $0x240] ss:$28 sps:$4 sm:$0xff]  }
 0x424   :  { %3648 = vmatprep.subr.bf16.mxu1 %v4941_v17  ;;  %3730 = vmatprep.subr.bf16.mxu0 %v4944_v19  ;;  %v5011_v17 = vld [vmem:[#allocation8 + $0x408] ss:$28 sps:$4 sm:$0xff]   ;;  %v5014_v19 = vld [vmem:[#allocation8 + $0x27c] ss:$28 sps:$4 sm:$0xff]  }
 0x427   :  { %3649 = vmatpush1.bf16.msra.mxu1 %v4939_v22  ;;  %3731 = vmatpush1.bf16.msra.mxu0 %v4942_v23  ;;  %v5015_v22 = vld [vmem:[#allocation8 + $0x600] ss:$28 sps:$4 sm:$0xff]   ;;  %v5012_v23 = vld [vmem:[#allocation8 + $0x278] ss:$28 sps:$4 sm:$0xff]  }
 0x428   :  { %3650 = vmatprep.subr.bf16.mxu1 %v4947_v24  ;;  %3732 = vmatprep.subr.bf16.mxu0 %v4950_v2  ;;  %v5016_v24 = vld [vmem:[#allocation8 + $0x440] ss:$28 sps:$4 sm:$0xff]   ;;  %v5019_v2 = vld [vmem:[#allocation8 + $0x2b4] ss:$28 sps:$4 sm:$0xff]  }
 0x42b   :  { %3651 = vmatpush1.bf16.msra.mxu1 %v4945_v26  ;;  %3733 = vmatpush1.bf16.msra.mxu0 %v4948_v28  ;;  %v5020_v26 = vld [vmem:[#allocation8 + $0x638] ss:$28 sps:$4 sm:$0xff]   ;;  %v5017_v28 = vld [vmem:[#allocation8 + $0x2b0] ss:$28 sps:$4 sm:$0xff]  }
 0x42c   :  { %3652 = vmatprep.subr.bf16.mxu1 %v4953_v21  ;;  %3734 = vmatprep.subr.bf16.mxu0 %v4956_v18  ;;  %v5021_v21 = vld [vmem:[#allocation8 + $0x478] ss:$28 sps:$4 sm:$0xff]   ;;  %v5024_v18 = vld [vmem:[#allocation8 + $0x2ec] ss:$28 sps:$4 sm:$0xff]  }
 0x42f   :  { %3653 = vmatpush1.bf16.msra.mxu1 %v4951_v30  ;;  %3735 = vmatpush1.bf16.msra.mxu0 %v4954_v31  ;;  %v5025_v30 = vld [vmem:[#allocation8 + $0x670] ss:$28 sps:$4 sm:$0xff]   ;;  %v5022_v31 = vld [vmem:[#allocation8 + $0x2e8] ss:$28 sps:$4 sm:$0xff]  }
 0x430   :  { %3745 = vmatprep.subr.bf16.mxu1 %v4959_v35  ;;  %4370 = vmatprep.subr.bf16.mxu0 %v4960_v39  ;;  %v5029_v35 = vld [vmem:[#allocation8 + $0x324] ss:$28 sps:$4 sm:$0xff]  }
 0x431   :  { %v5030_v39 = vld [vmem:[#allocation8 + $0x6a8] ss:$28 sps:$4 sm:$0xff]  }
 0x432   :  { %3655 = vmatmul.mubr.bf16.vlgmr.msra.gmra.mrb[8].mxu1 %v5501_v43  ;;  %3737 = vmatmul.mubr.bf16.vlgmr.msra.gmra.mrb[12].mxu0 %v5501_v43 }
 0x433   :  { %3746 = vmatpush1.bf16.msra.mxu1 %v4957_v34  ;;  %3777 = vmatprep.mubr.bf16.mxu1 %v5488_v25  ;;  %v5027_v34 = vld [vmem:[#allocation8 + $0x320] ss:$28 sps:$4 sm:$0xff]  }
 0x434   :  { %4371 = vmatpush3.bf16.msra.mxu0 %v4961_v32  ;;  %3859 = vmatprep.mubr.bf16.mxu0 %v5488_v25  ;;  %v4980_v25 = vld [vmem:[#allocation8 + $0x2b8] ss:$28 sps:$4 sm:$0xff]   ;;  %v5031_v32 = vld [vmem:[#allocation8 + $0x4e8] ss:$28 sps:$4 sm:$0xff]  }
 0x435   :  { %3747 = vmatprep.subr.bf16.mxu1 %v4964_v42  ;;  %4372 = vmatprep.subr.bf16.mxu0 %v4965_v36  ;;  %v5034_v42 = vld [vmem:[#allocation8 + $0x35c] ss:$28 sps:$4 sm:$0xff]  }
 0x436   :  { %v5035_v36 = vld [vmem:[#allocation8 + $0x6e0] ss:$28 sps:$4 sm:$0xff]  }
 0x437   :  { %3748 = vmatpush1.bf16.msra.mxu1 %v4962_v20  ;;  %v5032_v20 = vld [vmem:[#allocation8 + $0x358] ss:$28 sps:$4 sm:$0xff]  }
 0x438   :  { %4373 = vmatpush3.bf16.msra.mxu0 %v4966_v37  ;;  %3749 = vmatprep.subr.bf16.mxu1 %v4969_v38  ;;  %v5036_v37 = vld [vmem:[#allocation8 + $0x520] ss:$28 sps:$4 sm:$0xff]   ;;  %v5039_v38 = vld [vmem:[#allocation8 + $0x394] ss:$28 sps:$4 sm:$0xff]  }
 0x439   :  { %4374 = vmatprep.subr.bf16.mxu0 %v4970_v40  ;;  %v5037_v40 = vld [vmem:[#allocation8 + $0x390] ss:$28 sps:$4 sm:$0xff]  }
 0x43b   :  { %3750 = vmatpush1.bf16.msra.mxu1 %v4967_v41  ;;  %v5042_v41 = vld [vmem:[#allocation8 + $0x3cc] ss:$28 sps:$4 sm:$0xff]  }
 0x43c   :  { %4375 = vmatpush3.bf16.msra.mxu0 %v4971_v44  ;;  %3751 = vmatprep.subr.bf16.mxu1 %v4974_v46  ;;  %v5040_v44 = vld [vmem:[#allocation8 + $0x3c8] ss:$28 sps:$4 sm:$0xff]  }
 0x43d   :  { %4376 = vmatprep.subr.bf16.mxu0 %v4975_v47  ;;  %v5045_v46 = vld [vmem:[#allocation8 + $0x404] ss:$28 sps:$4 sm:$0xff]  }
 0x43e   :  { %v5043_v47 = vld [vmem:[#allocation8 + $0x400] ss:$28 sps:$4 sm:$0xff]  }
 0x43f   :  { %3752 = vmatpush1.bf16.msra.mxu1 %v4972_v48  ;;  %v5048_v48 = vld [vmem:[#allocation8 + $0x43c] ss:$28 sps:$4 sm:$0xff]  }
 0x440   :  { %4377 = vmatpush3.bf16.msra.mxu0 %v4976_v49  ;;  %3753 = vmatprep.subr.bf16.mxu1 %v4979_v50  ;;  %v5046_v49 = vld [vmem:[#allocation8 + $0x438] ss:$28 sps:$4 sm:$0xff]  }
 0x441   :  { %4378 = vmatprep.subr.bf16.mxu0 %v4980_v25  ;;  %v5051_v50 = vld [vmem:[#allocation8 + $0x474] ss:$28 sps:$4 sm:$0xff]  }
 0x442   :  { %v5049_v25 = vld [vmem:[#allocation8 + $0x470] ss:$28 sps:$4 sm:$0xff]  }
 0x443   :  { %3754 = vmatpush1.bf16.msra.mxu1 %v4977_v51  ;;  %v5052_v51 = vld [vmem:[#allocation8 + $0x4a8] ss:$28 sps:$4 sm:$0xff]  }
 0x444   :  { %4379 = vmatpush3.bf16.msra.mxu0 %v4981_v52  ;;  %3755 = vmatprep.subr.bf16.mxu1 %v4984_v53  ;;  %v5057_v52 = vld [vmem:[#allocation8 + $0x4e4] ss:$28 sps:$4 sm:$0xff]   ;;  %v5060_v53 = vld [vmem:[#allocation8 + $0x51c] ss:$28 sps:$4 sm:$0xff]  }
 0x445   :  { %4380 = vmatprep.subr.bf16.mxu0 %v4985_v54  ;;  %v5058_v54 = vld [vmem:[#allocation8 + $0x518] ss:$28 sps:$4 sm:$0xff]  }
 0x447   :  { %3756 = vmatpush1.bf16.msra.mxu1 %v4982_v55  ;;  %v5063_v55 = vld [vmem:[#allocation8 + $0x554] ss:$28 sps:$4 sm:$0xff]  }
 0x448   :  { %4381 = vmatpush3.bf16.msra.mxu0 %v4986_v56  ;;  %3757 = vmatprep.subr.bf16.mxu1 %v4989_v57  ;;  %v5061_v56 = vld [vmem:[#allocation8 + $0x550] ss:$28 sps:$4 sm:$0xff]  }
 0x449   :  { %4382 = vmatprep.subr.bf16.mxu0 %v4990_v58  ;;  %v5066_v57 = vld [vmem:[#allocation8 + $0x58c] ss:$28 sps:$4 sm:$0xff]  }
 0x44a   :  { %v5064_v58 = vld [vmem:[#allocation8 + $0x588] ss:$28 sps:$4 sm:$0xff]  }
 0x44b   :  { %3758 = vmatpush1.bf16.msra.mxu1 %v4987_v59  ;;  %v5069_v59 = vld [vmem:[#allocation8 + $0x5c4] ss:$28 sps:$4 sm:$0xff]  }
 0x44c   :  { %4383 = vmatpush3.bf16.msra.mxu0 %v4991_v60  ;;  %3759 = vmatprep.subr.bf16.mxu1 %v4994_v61  ;;  %v5067_v60 = vld [vmem:[#allocation8 + $0x5c0] ss:$28 sps:$4 sm:$0xff]  }
 0x44d   :  { %4384 = vmatprep.subr.bf16.mxu0 %v4995_v62  ;;  %v5072_v61 = vld [vmem:[#allocation8 + $0x5fc] ss:$28 sps:$4 sm:$0xff]  }
 0x44e   :  { %v5070_v62 = vld [vmem:[#allocation8 + $0x5f8] ss:$28 sps:$4 sm:$0xff]  }
 0x44f   :  { %3760 = vmatpush1.bf16.msra.mxu1 %v4992_v63  ;;  %v5075_v63 = vld [vmem:[#allocation8 + $0x634] ss:$28 sps:$4 sm:$0xff]  }
 0x450   :  { %4385 = vmatpush3.bf16.msra.mxu0 %v4996_v1  ;;  %3761 = vmatprep.subr.bf16.mxu1 %v4999_v4  ;;  %v5073_v1 = vld [vmem:[#allocation8 + $0x630] ss:$28 sps:$4 sm:$0xff]  }
 0x451   :  { %4392 = vmatprep.subr.bf16.mxu0 %v5000_v7  ;;  %v5078_v4 = vld [vmem:[#allocation8 + $0x66c] ss:$28 sps:$4 sm:$0xff]  }
 0x452   :  { %v5076_v7 = vld [vmem:[#allocation8 + $0x668] ss:$28 sps:$4 sm:$0xff]  }
 0x453   :  { %3860 = vmatmul.mubr.bf16.vlgmr.msra.gmra.mrb[16].mxu0 %v5490_v27  ;;  %3762 = vmatpush1.bf16.msra.mxu1 %v4997_v11  ;;  %v5081_v11 = vld [vmem:[#allocation8 + $0x6a4] ss:$28 sps:$4 sm:$0xff]  }
 0x454   :  { %4393 = vmatpush3.bf16.msra.mxu0 %v5001_v3  ;;  %3899 = vmatprep.mubr.bf16.mxu0 %v5496_v29  ;;  %v5079_v3 = vld [vmem:[#allocation8 + $0x6a0] ss:$28 sps:$4 sm:$0xff]  }
 0x455   :  { %3763 = vmatprep.subr.bf16.mxu1 %v5004_v6  ;;  %4394 = vmatprep.subr.bf16.mxu0 %v5005_v13  ;;  %v5084_v6 = vld [vmem:[#allocation8 + $0x6dc] ss:$28 sps:$4 sm:$0xff]  }
 0x456   :  { %v5082_v13 = vld [vmem:[#allocation8 + $0x6d8] ss:$28 sps:$4 sm:$0xff]  }
 0x457   :  { %3764 = vmatpush1.bf16.msra.mxu1 %v5002_v12  ;;  %v86_v12 = vld [vmem:[%s5540_s5 + $0x14] sm:$0xff]  ;;  %s5249_s5 = smov [#allocation10]  }
 0x458   :  { %4395 = vmatpush3.bf16.msra.mxu0 %v5006_v45  ;;  %3765 = vmatprep.subr.bf16.mxu1 %v5009_v5  ;;  %v2397_v45 = vrot.slane %v86_v12, %v5366_v8  ;;  %v2405_v5 = vrot.slane %v86_v12, %v5412_v15  ;;  %s3927_s14 = sshll.u32 %s5249_s5, 4  ;;  %s3928_s14 = int_to_ptr.vmem [resolvable:$true] %s3927_s14 }
 0x459   :  { %4396 = vmatprep.subr.bf16.mxu0 %v5010_v10  ;;  %v2401_v10 = vrot.slane %v86_v12, %v5369_v9  ;;  %s5207_s15 = scalar_lea.vmem %s3928_s14, 896  ;;  %p5212_p5 = scmp.lt.s32.totalorder %s3928_s14, %s3928_s14 }
 0x45a   :  { %p5208_p4 = scmp.ne.s32.totalorder %s3928_s14, %s5207_s15  ;;  %p5213_p6 = scmp.lt.s32.totalorder %s5207_s15, %s5207_s15 }
 0x45b   :  { %3766 = vmatpush1.bf16.msra.mxu1 %v5007_v14  ;;  %v2409_v14 = vrot.slane %v86_v12, %v5415_v16 }
 0x45c   :  { %4397 = vmatpush3.bf16.msra.mxu0 %v5011_v17  ;;  %3767 = vmatprep.subr.bf16.mxu1 %v5014_v19  ;;  %p5214_p7 = por %p5213_p6, %p5212_p5 }
 0x45d   :  { %4398 = vmatprep.subr.bf16.mxu0 %v5015_v22 }
 0x45e   :  { %p5215_p8 = pnand %p5214_p7, %p5208_p4 }
 0x45f   :  { %3768 = vmatpush1.bf16.msra.mxu1 %v5012_v23 }
 0x460   :  { %4399 = vmatpush3.bf16.msra.mxu0 %v5016_v24  ;;  %3769 = vmatprep.subr.bf16.mxu1 %v5019_v2 }
 0x461   :  { %4400 = vmatprep.subr.bf16.mxu0 %v5020_v26 }
 0x463   :  { %3770 = vmatpush1.bf16.msra.mxu1 %v5017_v28 }
 0x464   :  { %4401 = vmatpush3.bf16.msra.mxu0 %v5021_v21  ;;  %3771 = vmatprep.subr.bf16.mxu1 %v5024_v18 }
 0x465   :  { %4402 = vmatprep.subr.bf16.mxu0 %v5025_v30 }
 0x467   :  { %3772 = vmatpush1.bf16.msra.mxu1 %v5022_v31 }
 0x468   :  { %4403 = vmatpush3.bf16.msra.mxu0 %v5026_v33  ;;  %3773 = vmatprep.subr.bf16.mxu1 %v5029_v35 }
 0x469   :  { %4404 = vmatprep.subr.bf16.mxu0 %v5030_v39 }
 0x46b   :  { %3774 = vmatpush1.bf16.msra.mxu1 %v5027_v34 }
 0x46c   :  { %4405 = vmatpush3.bf16.msra.mxu0 %v5031_v32  ;;  %3775 = vmatprep.subr.bf16.mxu1 %v5034_v42  ;;  %v2420_v32 = vsub.s32 6, %v5355_v0 }
 0x46d   :  { %4406 = vmatprep.subr.bf16.mxu0 %v5035_v36 }
 0x46e   :  { %v2421_v42 = vrot.slane %v86_v12, %v2420_v32 }
 0x46f   :  { %3776 = vmatpush1.bf16.msra.mxu1 %v5032_v20 }
 0x470   :  { %4407 = vmatpush3.bf16.msra.mxu0 %v5036_v37  ;;  %3786 = vmatprep.subr.bf16.mxu1 %v5039_v38 }
 0x472   :  { %3778 = vmatmul.mubr.bf16.vlgmr.msra.gmra.mrb[12].mxu1 %v5490_v27  ;;  %v5054_v27 = vld [vmem:[#allocation8 + $0x4ac] ss:$28 sps:$4 sm:$0xff]  }
 0x473   :  { %3900 = vmatmul.mubr.bf16.vlgmr.msra.gmra.mrb[20].mxu0 %v5501_v43  ;;  %3787 = vmatpush1.bf16.msra.mxu1 %v5037_v40 }
 0x474   :  { %3818 = vmatprep.mubr.bf16.mxu1 %v5496_v29  ;;  %3788 = vmatprep.subr.bf16.mxu1 %v5042_v41  ;;  %v5055_v29 = vld [vmem:[#allocation8 + $0x4e0] ss:$28 sps:$4 sm:$0xff]  }
 0x477   :  { %3789 = vmatpush1.bf16.msra.mxu1 %v5040_v44 }
 0x478   :  { %3790 = vmatprep.subr.bf16.mxu1 %v5045_v46 }
 0x47b   :  { %3791 = vmatpush1.bf16.msra.mxu1 %v5043_v47  ;;  %v2412_v47 = vsub.s32 4, %v5355_v0 }
 0x47c   :  { %3792 = vmatprep.subr.bf16.mxu1 %v5048_v48  ;;  %v2416_v48 = vsub.s32 5, %v5355_v0 }
 0x47f   :  { %3793 = vmatpush1.bf16.msra.mxu1 %v5046_v49  ;;  %v2413_v49 = vrot.slane %v86_v12, %v2412_v47 }
 0x480   :  { %3794 = vmatprep.subr.bf16.mxu1 %v5051_v50  ;;  %v2417_v50 = vrot.slane %v86_v12, %v2416_v48 }
 0x483   :  { %3795 = vmatpush1.bf16.msra.mxu1 %v5049_v25 }
 0x484   :  { %3796 = vmatprep.subr.bf16.mxu1 %v5054_v27 }
 0x487   :  { %3797 = vmatpush1.bf16.msra.mxu1 %v5052_v51 }
 0x488   :  { %3798 = vmatprep.subr.bf16.mxu1 %v5057_v52 }
 0x48b   :  { %3799 = vmatpush1.bf16.msra.mxu1 %v5055_v29 }
 0x48c   :  { %3800 = vmatprep.subr.bf16.mxu1 %v5060_v53 }
 0x48f   :  { %3801 = vmatpush1.bf16.msra.mxu1 %v5058_v54 }
 0x490   :  { %3802 = vmatprep.subr.bf16.mxu1 %v5063_v55 }
 0x493   :  { %3803 = vmatpush1.bf16.msra.mxu1 %v5061_v56 }
 0x494   :  { %3804 = vmatprep.subr.bf16.mxu1 %v5066_v57 }
 0x497   :  { %3805 = vmatpush1.bf16.msra.mxu1 %v5064_v58 }
 0x498   :  { %3806 = vmatprep.subr.bf16.mxu1 %v5069_v59 }
 0x49b   :  { %3807 = vmatpush1.bf16.msra.mxu1 %v5067_v60 }
 0x49c   :  { %3808 = vmatprep.subr.bf16.mxu1 %v5072_v61 }
 0x49f   :  { %3809 = vmatpush1.bf16.msra.mxu1 %v5070_v62 }
 0x4a0   :  { %3810 = vmatprep.subr.bf16.mxu1 %v5075_v63 }
 0x4a3   :  { %3811 = vmatpush1.bf16.msra.mxu1 %v5073_v1 }
 0x4a4   :  { %3812 = vmatprep.subr.bf16.mxu1 %v5078_v4 }
 0x4a7   :  { %3813 = vmatpush1.bf16.msra.mxu1 %v5076_v7 }
 0x4a8   :  { %3814 = vmatprep.subr.bf16.mxu1 %v5081_v11 }
 0x4ab   :  { %3815 = vmatpush1.bf16.msra.mxu1 %v5079_v3 }
 0x4ac   :  { %3816 = vmatprep.subr.bf16.mxu1 %v5084_v6 }
 0x4af   :  { %3817 = vmatpush1.bf16.msra.mxu1 %v5082_v13 }
 0x4b2   :  { %3819 = vmatmul.mubr.bf16.vlgmr.msra.gmra.mrb[12].mxu1 %v5501_v43 }
 0x505   :  { %v3656_v17 = vpop.f32.mrb[8].mxu1  ;;  %v3738_v19 = vpop.f32.mrb[12].mxu0 }
 0x506   :  { %v4414_v22 = vadd.f32 %v3656_v17, %v2397_v45  ;;  %v4416_v23 = vadd.f32 %v3738_v19, %v2405_v5  ;;  %v3658_v24 = vpop.f32.mrb[9].mxu1  ;;  %v3740_v2 = vpop.f32.mrb[13].mxu0 }
 0x507   :  { %v4415_v26 = vadd.f32 %v3658_v24, %v2401_v10  ;;  %v4417_v43 = vadd.f32 %v3740_v2, %v2409_v14  ;;  %v3660_v28 = vpop.f32.mrb[10].mxu1  ;;  %v3742_v21 = vpop.f32.mrb[14].mxu0 }
 0x508   :  { %5105 = vtanh.f32 %v4414_v22  ;;  %v3661_v18 = vpop.f32.mrb[11].mxu1  ;;  %v3743_v30 = vpop.f32.mrb[15].mxu0 }
 0x509   :  { %5107 = vtanh.f32 %v4416_v23 }
 0x50a   :  { %5109 = vtanh.f32 %v4415_v26 }
 0x50b   :  { %5111 = vtanh.f32 %v4417_v43 }
 0x512   :  { %v5106_v8 = vpop.eup %5105 }
 0x513   :  { %v5108_v9 = vpop.eup %5107  ;;  %3914 = vst [vmem:[#allocation10] sm:$0xff] %v5106_v8 }
 0x514   :  { %v5110_v15 = vpop.eup %5109  ;;  %3916 = vst [vmem:[#allocation10 + $0x10] sm:$0xff] %v5108_v9 }
 0x515   :  { %v5112_v16 = vpop.eup %5111  ;;  %3915 = vst [vmem:[#allocation10 + $0x8] sm:$0xff] %v5110_v15 }
 0x516   :  { %3917 = vst [vmem:[#allocation10 + $0x18] sm:$0xff] %v5112_v16 }
 0x526   :  { %v4386_v31 = vpop.f32.mrb[16].mxu0 }
 0x527   :  { %v4387_v33 = vpop.f32.mrb[17].mxu0 }
 0x528   :  { %v4388_v35 = vadd.f32 %v4387_v33, %v4386_v31  ;;  %v4389_v39 = vpop.f32.mrb[18].mxu0 }
 0x529   :  { %v4390_v34 = vpop.f32.mrb[19].mxu0 }
 0x52a   :  { %v3862_v37 = vadd.f32 %v4388_v35, %v2421_v42 }
 0x546   :  { %v4408_v36 = vpop.f32.mrb[20].mxu0 }
 0x547   :  { %v4409_v20 = vpop.f32.mrb[21].mxu0 }
 0x548   :  { %v4410_v38 = vadd.f32 %v4409_v20, %v4408_v36  ;;  %v4411_v40 = vpop.f32.mrb[22].mxu0 }
 0x549   :  { %v4412_v41 = vpop.f32.mrb[23].mxu0 }
 0x54a   :  { %v3902_v44 = vadd.f32 %v4410_v38, %v3862_v37 }
 0x54c   :  { %5113 = vtanh.f32 %v3902_v44 }
 0x556   :  { %v5114_v46 = vpop.eup %5113 }
 0x557   :  { %3920 = vst [vmem:[#allocation10 + $0x30] sm:$0xff] %v5114_v46 }
 0x585   :  { %v3820_v25 = vpop.f32.mrb[12].mxu1 }
 0x586   :  { %v4418_v27 = vadd.f32 %v3820_v25, %v2413_v49  ;;  %v3822_v51 = vpop.f32.mrb[13].mxu1 }
 0x587   :  { %v4419_v52 = vadd.f32 %v3822_v51, %v2417_v50  ;;  %v3824_v29 = vpop.f32.mrb[14].mxu1 }
 0x588   :  { %5115 = vtanh.f32 %v4418_v27  ;;  %v3825_v53 = vpop.f32.mrb[15].mxu1 }
 0x589   :  { %5117 = vtanh.f32 %v4419_v52 }
 0x592   :  { %v5116_v54 = vpop.eup %5115 }
 0x593   :  { %v5118_v55 = vpop.eup %5117  ;;  %3918 = vst [vmem:[#allocation10 + $0x20] sm:$0xff] %v5116_v54 }
 0x594   :  { %3919 = vst [vmem:[#allocation10 + $0x28] sm:$0xff] %v5118_v55 }
 0x595   :  { %5218 = shalt.err (!%p5215_p8)
}
 0x596   :  { %s5219_s18 = scalar_lea.hbm %s5541_s6, 896 }
 0x597   :  { %p5220_p9 = scmp.ne.s32.totalorder %s5541_s6, %s5219_s18  ;;  %p5223_p10 = scmp.lt.u32.totalorder %s5219_s18, %s5541_s6 }
 0x599   :  { %p5225_p11 = pnand %p5223_p10, %p5220_p9 }
 0x59b   :  { %5228 = shalt.err (!%p5225_p11)
}
 0x59c   :  { %3930 = dma.vmem_to_hbm [thread:$0]  %s3928_s14, 896, %s5541_s6, [#allocation4]  }
 0x59d   :  { %5235 = dma.done.wait [#allocation4], 896  }
 0x59e   :  { %5236 = vsyncadd [#allocation4], 4294966400 }
 0x59f   :  { %3934 = vsyncpa [#allocation3], 1 }
 0x5a0   :  { %3935 = vsyncpa [#allocation6], 1 }
 0x5a1   :  { %3936 = vsyncpa [#allocation9], 1 }
 0x5a2   :  { %3937 = vsyncpa [#allocation4], 1 }

</bundles_post_ra>
